<compile_context>
chip_gen: v5e
topology: v5e:2x2
jax: 0.10.0
libtpu: 0.0.40
codegen_flags: <defaults>
</compile_context>

<pallas_src>
import functools

import jax
import jax.numpy as jnp
from jax.experimental import pallas as pl
from jax.experimental.pallas import tpu as pltpu

_ROWS = 8  # sublane rows of the dense output slab


def _round_up(x, m):
    return (x + m - 1) // m * m


def ensemble_kernel(xa_ref, xb_ref, wa_ref, wb_ref, b_ref, pred_ref, *,
                    num_models, num_classes, rows):
    """Per-tile ensemble forward (avg2 path).

    xa_ref/xb_ref: (1, C, T)      -- T pixels on lanes, channels on sublanes
    wa_ref/wb_ref: (M*n_cls, C)   -- fused 1x1-conv weights of all models
    b_ref:         (M*n_cls, 1)
    pred_ref:      (1, 1, rows, T//rows) int32 -- dense prediction slab
    """
    xa = xa_ref[0].astype(jnp.float32)            # (C, T)
    xb = xb_ref[0].astype(jnp.float32)            # (C, T)
    wa = wa_ref[...].astype(jnp.float32)          # (M*n_cls, C)
    wb = wb_ref[...].astype(jnp.float32)          # (M*n_cls, C)
    b = b_ref[...].astype(jnp.float32)            # (M*n_cls, 1)

    # One fused matmul pair for all models & classes -> (M*n_cls, T);
    # pixels stay on the lane axis the whole way.
    logits = (jnp.dot(wa, xa, preferred_element_type=jnp.float32)
              + jnp.dot(wb, xb, preferred_element_type=jnp.float32)
              + b)

    T = logits.shape[-1]
    acc = jnp.zeros((num_classes, T), jnp.float32)
    for m in range(num_models):                   # static unroll; ensemble is tiny
        l = logits[m * num_classes:(m + 1) * num_classes, :]   # (n_cls, T)
        # F.softmax(out, dim=1): class dim is the sublane (row) axis here.
        mx = jnp.max(l, axis=0, keepdims=True)
        e = jnp.exp(l - mx)                                       # EUP
        inv = pl.reciprocal(jnp.sum(e, axis=0, keepdims=True), approx=True)
        acc = acc + e * inv                       # out1 += softmax(outs[0])

    # torch.max(out1, 1).indices -- first maximal class on ties (torch's tie
    # index is backend-dependent; first-max is the common/portable choice).
    cls_idx = jax.lax.broadcasted_iota(jnp.int32, acc.shape, 0)
    amax = jnp.max(acc, axis=0, keepdims=True)
    idx = jnp.where(acc >= amax, cls_idx, num_classes)
    pred = jnp.min(idx, axis=0).astype(jnp.int32)  # (T,)

    # Lane -> sublane retile so the output block is a dense (rows, T//rows)
    # slab: the HBM writeback is one contiguous unmasked store per step.
    lanes = T // rows
    for r in range(rows):
        pred_ref[0, 0, r, :] = pred[r * lanes:(r + 1) * lanes]


def ensemble_forward(xa, xb, weights, biases, *, num_classes=2, tile_pix=8192):
    """xa, xb: (B, C, H, W) float32 (NCHW).  Returns (B, H, W) int32 cd_pred.

    weights: (M, 2*C, n_cls) synthetic 1x1-conv weights (channels 0..C-1 act
             on xa, C..2C-1 on xb).  biases: (M, 1, n_cls).
    """
    B, C, H, W = xa.shape
    M = weights.shape[0]
    HW = H * W

    # Fuse all models' weights: row m*n_cls + k <-> class k of model m.
    w_all = jnp.transpose(weights, (0, 2, 1)).reshape(M * num_classes, 2 * C)
    wa = w_all[:, :C]
    wb = w_all[:, C:]
    b_all = jnp.transpose(biases, (0, 2, 1)).reshape(M * num_classes, 1)

    # Pixels-on-lanes layout: NCHW -> (B, C, H*W) is a free reshape; no
    # transpose / concat relayout passes over the (memory-bound) input.
    xa_r = xa.reshape(B, C, HW)
    xb_r = xb.reshape(B, C, HW)

    # Tile size: multiple of ROWS*128 so the output slab is (8, k*128).
    tile = _round_up(min(tile_pix, _round_up(HW, _ROWS * 128)), _ROWS * 128)
    hw_pad = _round_up(HW, tile)
    if hw_pad != HW:                     # remainder path: pad, slice off later
        pad = hw_pad - HW
        xa_r = jnp.pad(xa_r, ((0, 0), (0, 0), (0, pad)))
        xb_r = jnp.pad(xb_r, ((0, 0), (0, 0), (0, pad)))
    nt = hw_pad // tile
    lanes = tile // _ROWS

    kernel = functools.partial(
        ensemble_kernel, num_models=M, num_classes=num_classes, rows=_ROWS)

    pred = pl.pallas_call(
        kernel,
        out_shape=jax.ShapeDtypeStruct((B, nt, _ROWS, lanes), jnp.int32),
        grid_spec=pltpu.PrefetchScalarGridSpec(
            num_scalar_prefetch=0,
            grid=(B, nt),
            in_specs=[
                pl.BlockSpec((1, C, tile), lambda b, i: (b, 0, i)),
                pl.BlockSpec((1, C, tile), lambda b, i: (b, 0, i)),
                pl.BlockSpec((M * num_classes, C), lambda b, i: (0, 0)),
                pl.BlockSpec((M * num_classes, C), lambda b, i: (0, 0)),
                pl.BlockSpec((M * num_classes, 1), lambda b, i: (0, 0)),
            ],
            out_specs=pl.BlockSpec((1, 1, _ROWS, lanes),
                                   lambda b, i: (b, i, 0, 0)),
        ),
        compiler_params=pltpu.CompilerParams(
            dimension_semantics=("parallel", "parallel")),
    )(xa_r, xb_r, wa, wb, b_all)

    # (B, nt, 8, lanes) flattens row-major back to pixel order.
    return pred.reshape(B, hw_pad)[:, :HW].reshape(B, H, W)


def ensemble_reference(xa, xb, weights, biases):
    """Pure-JAX reference of the avg2 ensemble forward (for validation)."""
    B, C, H, W = xa.shape
    xa_ = jnp.transpose(xa, (0, 2, 3, 1)).reshape(-1, C)
    xb_ = jnp.transpose(xb, (0, 2, 3, 1)).reshape(-1, C)
    x = jnp.concatenate([xa_, xb_], axis=-1)          # (N, 2C)
    acc = 0.0
    for m in range(weights.shape[0]):
        logits = x @ weights[m] + biases[m, 0]
        acc = acc + jax.nn.softmax(logits, axis=-1)
    pred = jnp.argmax(acc, axis=-1).astype(jnp.int32).reshape(B, H, W)
    return pred, acc.reshape(B, H, W, -1)


if __name__ == "__main__":
    B, C, H, W = 2, 4, 16, 16        # small NCHW inputs; input_size == 16
    M = 3                            # 3 ensemble members
    NUM_CLASSES = 2                  # change / no-change

    key = jax.random.PRNGKey(0)
    k_xa, k_xb, k_w, k_b = jax.random.split(key, 4)

    xa = jax.random.normal(k_xa, (B, C, H, W), jnp.float32)
    xb = jax.random.normal(k_xb, (B, C, H, W), jnp.float32)

    # Deterministic synthetic sub-model params: per-model 1x1-conv weights.
    weights = 0.5 * jax.random.normal(k_w, (M, 2 * C, NUM_CLASSES), jnp.float32)
    biases = 0.1 * jax.random.normal(k_b, (M, 1, NUM_CLASSES), jnp.float32)

    pred = ensemble_forward(xa, xb, weights, biases, num_classes=NUM_CLASSES)
    pred = jax.block_until_ready(pred)

    ref_pred, ref_acc = ensemble_reference(xa, xb, weights, biases)
    assert pred.shape == (B, H, W) and pred.dtype == jnp.int32

    # Validation: every confidently-classified pixel must match exactly; pixels
    # within ~1e-3 of a class tie may legitimately flip under the approximate
    # reciprocal used for the softmax normalization.
    agree = pred == ref_pred
    s = jnp.sort(ref_acc, axis=-1)
    margin = s[..., -1] - s[..., -2]
    assert bool(jnp.all(agree | (margin < 1e-3))), "mismatch at confident pixels"
    assert float(jnp.mean(agree)) > 0.99, "too many mismatches vs reference"

    print("KERNEL_OK")
</pallas_src>

<mosaic_0001>
module attributes {stable_mosaic.version = 11 : i64} {
  func.func @ensemble_kernel(%arg0: i32, %arg1: i32, %arg2: memref<1x4x1024xf32, #tpu.memory_space<vmem>>, %arg3: memref<1x4x1024xf32, #tpu.memory_space<vmem>>, %arg4: memref<6x4xf32, #tpu.memory_space<vmem>>, %arg5: memref<6x4xf32, #tpu.memory_space<vmem>>, %arg6: memref<6x1xf32, #tpu.memory_space<vmem>>, %arg7: memref<1x1x8x128xi32, #tpu.memory_space<vmem>>) attributes {dimension_semantics = [#tpu.dimension_semantics<parallel>, #tpu.dimension_semantics<parallel>], iteration_bounds = array<i64: 2, 1>, scalar_prefetch = 0 : i64, scratch_operands = 0 : i64, tpu.core_type = #tpu.core_type<tc>, window_params = [{transform_indices = @transform_0, window_bounds = array<i64: 1, 4, 1024>}, {transform_indices = @transform_1, window_bounds = array<i64: 1, 4, 1024>}, {pipeline_mode = #tpu.pipeline_mode<synchronous>, transform_indices = @transform_2, window_bounds = array<i64: 6, 4>}, {pipeline_mode = #tpu.pipeline_mode<synchronous>, transform_indices = @transform_3, window_bounds = array<i64: 6, 4>}, {pipeline_mode = #tpu.pipeline_mode<synchronous>, transform_indices = @transform_4, window_bounds = array<i64: 6, 1>}, {transform_indices = @transform_5, window_bounds = array<i64: 1, 1, 8, 128>}]} {
    %c0 = arith.constant 0 : index
    %c0_0 = arith.constant 0 : index
    %c0_1 = arith.constant 0 : index
    %0 = vector.load %arg2[%c0, %c0_0, %c0_1] : memref<1x4x1024xf32, #tpu.memory_space<vmem>>, vector<1x4x1024xf32>
    %1 = vector.shape_cast %0 : vector<1x4x1024xf32> to vector<4x1024xf32>
    %c0_2 = arith.constant 0 : index
    %c0_3 = arith.constant 0 : index
    %c0_4 = arith.constant 0 : index
    %2 = vector.load %arg3[%c0_2, %c0_3, %c0_4] : memref<1x4x1024xf32, #tpu.memory_space<vmem>>, vector<1x4x1024xf32>
    %3 = vector.shape_cast %2 : vector<1x4x1024xf32> to vector<4x1024xf32>
    %c0_5 = arith.constant 0 : index
    %c0_6 = arith.constant 0 : index
    %4 = vector.load %arg4[%c0_5, %c0_6] : memref<6x4xf32, #tpu.memory_space<vmem>>, vector<6x4xf32>
    %c0_7 = arith.constant 0 : index
    %c0_8 = arith.constant 0 : index
    %5 = vector.load %arg5[%c0_7, %c0_8] : memref<6x4xf32, #tpu.memory_space<vmem>>, vector<6x4xf32>
    %c0_9 = arith.constant 0 : index
    %c0_10 = arith.constant 0 : index
    %6 = vector.load %arg6[%c0_9, %c0_10] : memref<6x1xf32, #tpu.memory_space<vmem>>, vector<6x1xf32>
    %cst = arith.constant dense<0.000000e+00> : vector<6x1024xf32>
    %7 = tpu.matmul %4, %1, %cst {dimension_numbers = #tpu.dot_dimension_numbers<[1], [0], [0], [1], [0, 0, 1, 1], [], []>} : vector<6x4xf32>, vector<4x1024xf32>, vector<6x1024xf32> -> vector<6x1024xf32>
    %cst_11 = arith.constant dense<0.000000e+00> : vector<6x1024xf32>
    %8 = tpu.matmul %5, %3, %cst_11 {dimension_numbers = #tpu.dot_dimension_numbers<[1], [0], [0], [1], [0, 0, 1, 1], [], []>} : vector<6x4xf32>, vector<4x1024xf32>, vector<6x1024xf32> -> vector<6x1024xf32>
    %9 = arith.addf %7, %8 : vector<6x1024xf32>
    %10 = vector.broadcast %6 : vector<6x1xf32> to vector<6x1024xf32>
    %11 = arith.addf %9, %10 : vector<6x1024xf32>
    %cst_12 = arith.constant 0.000000e+00 : f32
    %12 = vector.broadcast %cst_12 : f32 to vector<2x1024xf32>
    %13 = vector.extract_strided_slice %11 {offsets = [0, 0], sizes = [2, 1024], strides = [1, 1]} : vector<6x1024xf32> to vector<2x1024xf32>
    %cst_13 = arith.constant dense<0xFF800000> : vector<1024xf32>
    %14 = vector.multi_reduction <maximumf>, %13, %cst_13 [0] : vector<2x1024xf32> to vector<1024xf32>
    %15 = vector.shape_cast %14 : vector<1024xf32> to vector<1x1024xf32>
    %16 = vector.broadcast %15 : vector<1x1024xf32> to vector<2x1024xf32>
    %17 = arith.subf %13, %16 : vector<2x1024xf32>
    %18 = math.exp %17 : vector<2x1024xf32>
    %cst_14 = arith.constant dense<0.000000e+00> : vector<1024xf32>
    %19 = vector.multi_reduction <add>, %18, %cst_14 [0] : vector<2x1024xf32> to vector<1024xf32>
    %20 = vector.shape_cast %19 : vector<1024xf32> to vector<1x1024xf32>
    %21 = tpu.reciprocal %20 {approx = true} : vector<1x1024xf32> -> vector<1x1024xf32>
    %22 = vector.broadcast %21 : vector<1x1024xf32> to vector<2x1024xf32>
    %23 = arith.mulf %18, %22 : vector<2x1024xf32>
    %24 = arith.addf %12, %23 : vector<2x1024xf32>
    %25 = vector.extract_strided_slice %11 {offsets = [2, 0], sizes = [2, 1024], strides = [1, 1]} : vector<6x1024xf32> to vector<2x1024xf32>
    %cst_15 = arith.constant dense<0xFF800000> : vector<1024xf32>
    %26 = vector.multi_reduction <maximumf>, %25, %cst_15 [0] : vector<2x1024xf32> to vector<1024xf32>
    %27 = vector.shape_cast %26 : vector<1024xf32> to vector<1x1024xf32>
    %28 = vector.broadcast %27 : vector<1x1024xf32> to vector<2x1024xf32>
    %29 = arith.subf %25, %28 : vector<2x1024xf32>
    %30 = math.exp %29 : vector<2x1024xf32>
    %cst_16 = arith.constant dense<0.000000e+00> : vector<1024xf32>
    %31 = vector.multi_reduction <add>, %30, %cst_16 [0] : vector<2x1024xf32> to vector<1024xf32>
    %32 = vector.shape_cast %31 : vector<1024xf32> to vector<1x1024xf32>
    %33 = tpu.reciprocal %32 {approx = true} : vector<1x1024xf32> -> vector<1x1024xf32>
    %34 = vector.broadcast %33 : vector<1x1024xf32> to vector<2x1024xf32>
    %35 = arith.mulf %30, %34 : vector<2x1024xf32>
    %36 = arith.addf %24, %35 : vector<2x1024xf32>
    %37 = vector.extract_strided_slice %11 {offsets = [4, 0], sizes = [2, 1024], strides = [1, 1]} : vector<6x1024xf32> to vector<2x1024xf32>
    %cst_17 = arith.constant dense<0xFF800000> : vector<1024xf32>
    %38 = vector.multi_reduction <maximumf>, %37, %cst_17 [0] : vector<2x1024xf32> to vector<1024xf32>
    %39 = vector.shape_cast %38 : vector<1024xf32> to vector<1x1024xf32>
    %40 = vector.broadcast %39 : vector<1x1024xf32> to vector<2x1024xf32>
    %41 = arith.subf %37, %40 : vector<2x1024xf32>
    %42 = math.exp %41 : vector<2x1024xf32>
    %cst_18 = arith.constant dense<0.000000e+00> : vector<1024xf32>
    %43 = vector.multi_reduction <add>, %42, %cst_18 [0] : vector<2x1024xf32> to vector<1024xf32>
    %44 = vector.shape_cast %43 : vector<1024xf32> to vector<1x1024xf32>
    %45 = tpu.reciprocal %44 {approx = true} : vector<1x1024xf32> -> vector<1x1024xf32>
    %46 = vector.broadcast %45 : vector<1x1024xf32> to vector<2x1024xf32>
    %47 = arith.mulf %42, %46 : vector<2x1024xf32>
    %48 = arith.addf %36, %47 : vector<2x1024xf32>
    %49 = tpu.iota {dimensions = array<i32: 0>} : vector<2x1024xi32>
    %cst_19 = arith.constant dense<0xFF800000> : vector<1024xf32>
    %50 = vector.multi_reduction <maximumf>, %48, %cst_19 [0] : vector<2x1024xf32> to vector<1024xf32>
    %51 = vector.shape_cast %50 : vector<1024xf32> to vector<1x1024xf32>
    %52 = vector.broadcast %51 : vector<1x1024xf32> to vector<2x1024xf32>
    %53 = arith.cmpf oge, %48, %52 : vector<2x1024xf32>
    %c2_i32 = arith.constant 2 : i32
    %54 = vector.broadcast %c2_i32 : i32 to vector<2x1024xi32>
    %55 = arith.select %53, %49, %54 : vector<2x1024xi1>, vector<2x1024xi32>
    %cst_20 = arith.constant dense<2147483647> : vector<1024xi32>
    %56 = vector.multi_reduction <minsi>, %55, %cst_20 [0] : vector<2x1024xi32> to vector<1024xi32>
    %57 = vector.extract_strided_slice %56 {offsets = [0], sizes = [128], strides = [1]} : vector<1024xi32> to vector<128xi32>
    %c0_21 = arith.constant 0 : index
    %c0_22 = arith.constant 0 : index
    %c0_23 = arith.constant 0 : index
    %c0_24 = arith.constant 0 : index
    %58 = vector.load %arg7[%c0_21, %c0_22, %c0_23, %c0_24] : memref<1x1x8x128xi32, #tpu.memory_space<vmem>>, vector<1x1x1x128xi32>
    %59 = vector.shape_cast %58 : vector<1x1x1x128xi32> to vector<128xi32>
    %60 = vector.shape_cast %57 : vector<128xi32> to vector<1x1x1x128xi32>
    tpu.vector_store %arg7[%c0_21, %c0_22, %c0_23, %c0_24], %60 {strides = array<i32>} : memref<1x1x8x128xi32, #tpu.memory_space<vmem>>, vector<1x1x1x128xi32>,
    %61 = vector.extract_strided_slice %56 {offsets = [128], sizes = [128], strides = [1]} : vector<1024xi32> to vector<128xi32>
    %c0_25 = arith.constant 0 : index
    %c0_26 = arith.constant 0 : index
    %c1 = arith.constant 1 : index
    %c0_27 = arith.constant 0 : index
    %62 = vector.load %arg7[%c0_25, %c0_26, %c1, %c0_27] : memref<1x1x8x128xi32, #tpu.memory_space<vmem>>, vector<1x1x1x128xi32>
    %63 = vector.shape_cast %62 : vector<1x1x1x128xi32> to vector<128xi32>
    %64 = vector.shape_cast %61 : vector<128xi32> to vector<1x1x1x128xi32>
    tpu.vector_store %arg7[%c0_25, %c0_26, %c1, %c0_27], %64 {strides = array<i32>} : memref<1x1x8x128xi32, #tpu.memory_space<vmem>>, vector<1x1x1x128xi32>,
    %65 = vector.extract_strided_slice %56 {offsets = [256], sizes = [128], strides = [1]} : vector<1024xi32> to vector<128xi32>
    %c0_28 = arith.constant 0 : index
    %c0_29 = arith.constant 0 : index
    %c2 = arith.constant 2 : index
    %c0_30 = arith.constant 0 : index
    %66 = vector.load %arg7[%c0_28, %c0_29, %c2, %c0_30] : memref<1x1x8x128xi32, #tpu.memory_space<vmem>>, vector<1x1x1x128xi32>
    %67 = vector.shape_cast %66 : vector<1x1x1x128xi32> to vector<128xi32>
    %68 = vector.shape_cast %65 : vector<128xi32> to vector<1x1x1x128xi32>
    tpu.vector_store %arg7[%c0_28, %c0_29, %c2, %c0_30], %68 {strides = array<i32>} : memref<1x1x8x128xi32, #tpu.memory_space<vmem>>, vector<1x1x1x128xi32>,
    %69 = vector.extract_strided_slice %56 {offsets = [384], sizes = [128], strides = [1]} : vector<1024xi32> to vector<128xi32>
    %c0_31 = arith.constant 0 : index
    %c0_32 = arith.constant 0 : index
    %c3 = arith.constant 3 : index
    %c0_33 = arith.constant 0 : index
    %70 = vector.load %arg7[%c0_31, %c0_32, %c3, %c0_33] : memref<1x1x8x128xi32, #tpu.memory_space<vmem>>, vector<1x1x1x128xi32>
    %71 = vector.shape_cast %70 : vector<1x1x1x128xi32> to vector<128xi32>
    %72 = vector.shape_cast %69 : vector<128xi32> to vector<1x1x1x128xi32>
    tpu.vector_store %arg7[%c0_31, %c0_32, %c3, %c0_33], %72 {strides = array<i32>} : memref<1x1x8x128xi32, #tpu.memory_space<vmem>>, vector<1x1x1x128xi32>,
    %73 = vector.extract_strided_slice %56 {offsets = [512], sizes = [128], strides = [1]} : vector<1024xi32> to vector<128xi32>
    %c0_34 = arith.constant 0 : index
    %c0_35 = arith.constant 0 : index
    %c4 = arith.constant 4 : index
    %c0_36 = arith.constant 0 : index
    %74 = vector.load %arg7[%c0_34, %c0_35, %c4, %c0_36] : memref<1x1x8x128xi32, #tpu.memory_space<vmem>>, vector<1x1x1x128xi32>
    %75 = vector.shape_cast %74 : vector<1x1x1x128xi32> to vector<128xi32>
    %76 = vector.shape_cast %73 : vector<128xi32> to vector<1x1x1x128xi32>
    tpu.vector_store %arg7[%c0_34, %c0_35, %c4, %c0_36], %76 {strides = array<i32>} : memref<1x1x8x128xi32, #tpu.memory_space<vmem>>, vector<1x1x1x128xi32>,
    %77 = vector.extract_strided_slice %56 {offsets = [640], sizes = [128], strides = [1]} : vector<1024xi32> to vector<128xi32>
    %c0_37 = arith.constant 0 : index
    %c0_38 = arith.constant 0 : index
    %c5 = arith.constant 5 : index
    %c0_39 = arith.constant 0 : index
    %78 = vector.load %arg7[%c0_37, %c0_38, %c5, %c0_39] : memref<1x1x8x128xi32, #tpu.memory_space<vmem>>, vector<1x1x1x128xi32>
    %79 = vector.shape_cast %78 : vector<1x1x1x128xi32> to vector<128xi32>
    %80 = vector.shape_cast %77 : vector<128xi32> to vector<1x1x1x128xi32>
    tpu.vector_store %arg7[%c0_37, %c0_38, %c5, %c0_39], %80 {strides = array<i32>} : memref<1x1x8x128xi32, #tpu.memory_space<vmem>>, vector<1x1x1x128xi32>,
    %81 = vector.extract_strided_slice %56 {offsets = [768], sizes = [128], strides = [1]} : vector<1024xi32> to vector<128xi32>
    %c0_40 = arith.constant 0 : index
    %c0_41 = arith.constant 0 : index
    %c6 = arith.constant 6 : index
    %c0_42 = arith.constant 0 : index
    %82 = vector.load %arg7[%c0_40, %c0_41, %c6, %c0_42] : memref<1x1x8x128xi32, #tpu.memory_space<vmem>>, vector<1x1x1x128xi32>
    %83 = vector.shape_cast %82 : vector<1x1x1x128xi32> to vector<128xi32>
    %84 = vector.shape_cast %81 : vector<128xi32> to vector<1x1x1x128xi32>
    tpu.vector_store %arg7[%c0_40, %c0_41, %c6, %c0_42], %84 {strides = array<i32>} : memref<1x1x8x128xi32, #tpu.memory_space<vmem>>, vector<1x1x1x128xi32>,
    %85 = vector.extract_strided_slice %56 {offsets = [896], sizes = [128], strides = [1]} : vector<1024xi32> to vector<128xi32>
    %c0_43 = arith.constant 0 : index
    %c0_44 = arith.constant 0 : index
    %c7 = arith.constant 7 : index
    %c0_45 = arith.constant 0 : index
    %86 = vector.load %arg7[%c0_43, %c0_44, %c7, %c0_45] : memref<1x1x8x128xi32, #tpu.memory_space<vmem>>, vector<1x1x1x128xi32>
    %87 = vector.shape_cast %86 : vector<1x1x1x128xi32> to vector<128xi32>
    %88 = vector.shape_cast %85 : vector<128xi32> to vector<1x1x1x128xi32>
    tpu.vector_store %arg7[%c0_43, %c0_44, %c7, %c0_45], %88 {strides = array<i32>} : memref<1x1x8x128xi32, #tpu.memory_space<vmem>>, vector<1x1x1x128xi32>,
    return
  }
  func.func @transform_0(%arg0: i32, %arg1: i32) -> (i32, i32, i32) {
    %c0_i32 = arith.constant 0 : i32
    %c0_i32_0 = arith.constant 0 : i32
    return %arg0, %c0_i32, %arg1 : i32, i32, i32
  }
  func.func @transform_1(%arg0: i32, %arg1: i32) -> (i32, i32, i32) {
    %c0_i32 = arith.constant 0 : i32
    %c0_i32_0 = arith.constant 0 : i32
    return %arg0, %c0_i32, %arg1 : i32, i32, i32
  }
  func.func @transform_2(%arg0: i32, %arg1: i32) -> (i32, i32) {
    %c0_i32 = arith.constant 0 : i32
    %c0_i32_0 = arith.constant 0 : i32
    %c0_i32_1 = arith.constant 0 : i32
    return %c0_i32, %c0_i32_0 : i32, i32
  }
  func.func @transform_3(%arg0: i32, %arg1: i32) -> (i32, i32) {
    %c0_i32 = arith.constant 0 : i32
    %c0_i32_0 = arith.constant 0 : i32
    %c0_i32_1 = arith.constant 0 : i32
    return %c0_i32, %c0_i32_0 : i32, i32
  }
  func.func @transform_4(%arg0: i32, %arg1: i32) -> (i32, i32) {
    %c0_i32 = arith.constant 0 : i32
    %c0_i32_0 = arith.constant 0 : i32
    %c0_i32_1 = arith.constant 0 : i32
    return %c0_i32, %c0_i32_0 : i32, i32
  }
  func.func @transform_5(%arg0: i32, %arg1: i32) -> (i32, i32, i32, i32) {
    %c0_i32 = arith.constant 0 : i32
    %c0_i32_0 = arith.constant 0 : i32
    %c0_i32_1 = arith.constant 0 : i32
    return %arg0, %arg1, %c0_i32, %c0_i32_0 : i32, i32, i32, i32
  }
}

</mosaic_0001>

<bundles_post_ra>
// kernel: tpu_custom_call.1
= control target key start
LH: loop header
LB: loop body
LE: loop exit
PB: predicated region body
PF: predicated region fallthrough
CT: control target
= control target key end

     0   :  { %10 = vsyncpa [#allocation3], 0  ;;  %s2525_s0 = inlined_call_operand.hbm [shape: f32[2,4,1024], index: 0, kind: input, shape index: {}]   ;;  %s2526_s1 = inlined_call_operand.hbm [shape: f32[2,4,1024], index: 1, kind: input, shape index: {}]   ;;  %s2527_s2 = inlined_call_operand.vmem [shape: f32[6,4], index: 2, kind: input, shape index: {}]   ;;  %s2528_s3 = inlined_call_operand.vmem [shape: f32[6,4], index: 3, kind: input, shape index: {}]   ;;  %s2529_s4 = inlined_call_operand.vmem [shape: f32[6,1], index: 4, kind: input, shape index: {}]   ;;  %s2530_s5 = inlined_call_operand.hbm [shape: s32[2,1,8,128], index: 5, kind: output, shape index: {}]  }
   0x1   :  { %12 = vsyncpa [#allocation3 + $0x1], 0 }
   0x2   :  { %13 = vsyncpa [#allocation6], 0 }
   0x3   :  { %15 = vsyncpa [#allocation6 + $0x1], 0 }
   0x4   :  { %16 = vsyncpa [#allocation4], 0 }
   0x5   :  { %18 = vsyncpa [#allocation4 + $0x1], 0  ;;  %s1991_s18 = smov 0   ;;  %s1993_s19 = smov 0  }
   0x6   :  { %s1995_s20 = smov 0   ;;  %s1997_s21 = smov 0  }
   0x7   :  { %s1999_s22 = smov 0   ;;  %s2001_s23 = smov 0  }
   0x8 LB: > { %2533 = sst [smem:[#allocation11_spill]] %s1954_s22  ;;  %s1595_s24 = sadd.s32 4294967295, %s1958_s23   ;;  %s1958_s23 = sphi %s2001_s23, %s24_s23   ;;  %s1954_s22 = sphi %s1999_s22, %s2546_s22   ;;  %s1950_s21 = sphi %s1997_s21, %s2545_s21   ;;  %s1946_s20 = sphi %s1995_s20, %s2549_s20   ;;  %s1942_s19 = sphi %s1993_s19, %s2548_s19   ;;  %s1938_s18 = sphi %s1991_s18, %s2547_s18  }
   0x9   : > { %s1596_s25 = sadd.s32 4294967294, %s1958_s23   ;;  %s36_s26 = sadd.s32 1, %s1954_s22 }
   0xa   : > { %s45_s27 = sadd.s32 1, %s1946_s20  ;;  %p38_p0 = scmp.ge.s32.totalorder %s36_s26, 2 }
   0xb   : > { %p52_p1 = scmp.ne.s32.totalorder %s1946_s20, %s1942_s19  ;;  %p53_p2 = scmp.eq.s32.totalorder %s1958_s23, 0 }
   0xc   : > { %p58_p3 = scmp.ne.s32.totalorder %s1942_s19, %s1938_s18  ;;  %s2551_s26 = smov (%p38_p0, %s36_s26), 0 }
   0xd   : > { %2534 = sst [smem:[#allocation12_spill]] %s2551_s26  ;;  %p2032_p4 = por %p53_p2, %p52_p1 }
   0xe   : > { %p59_p5 = scmp.eq.s32.totalorder %s1595_s24, 0  ;;  %s40_s29 = ssub.s32 %s1954_s22, %s2551_s26 }
   0xf   : > { %p175_p6 = scmp.eq.s32.totalorder %s1595_s24, 1  ;;  %p43_p7 = scmp.eq.s32.totalorder %s40_s29, 0 }
  0x10   : > { %p2038_p8 = por %p59_p5, %p58_p3  ;;  %p181_p10 = scmp.eq.s32.totalorder %s1596_s25, 1 }
  0x11   : > { %p2042_p9 = por %p175_p6, %p52_p1  ;;  %p1598_p12 = scmp.ge.s32.totalorder %s1958_s23, 2 }
  0x12   : > { %s2047_s7 = scalar_select %p43_p7, %s1946_s20, %s45_s27  }
  0x13   : > { %p2049_p11 = por %p181_p10, %p58_p3  ;;  %p1664_p13 = scmp.lt.s32.totalorder %s1958_s23, 2 }
  0x14   : > { %s210_s9 = sand.u32 1, %s1946_s20   ;;  %s1645_s11 = sshll.u32 %s1954_s22, 5 }
  0x15   : > { %s1599_s10 = sshll.u32 %s210_s9, 5  ;;  %s221_s14 = scalar_lea.hbm %s2525_s0, %s1645_s11 }
  0x16   : > { %s214_s15 = scalar_lea.vmem [#allocation2], %s1599_s10  ;;  %s223_s17 = sshll.u32 %s221_s14, 4  ;;  %s224_s17 = int_to_ptr.hbm [resolvable:$true] %s223_s17 }
  0x17   : > { %s225_s16 = sshll.u32 %s214_s15, 4  ;;  %p1654_p0 = pnand %p1664_p13, %p2032_p4  ;;  %s226_s16 = int_to_ptr.vmem [resolvable:$true] %s225_s16 }
  0x18   : > { %p1605_p1 = scmp.ge.s32.totalorder %s1958_s23, 1  ;;  %p252_p2 = scmp.lt.s32.totalorder %s1958_s23, 3 }
  0x19   : > { %s211_s24 = scalar_lea.sflag [#allocation3], %s210_s9  ;;  %s243_s29 = scalar_lea.hbm %s2526_s1, %s1645_s11 }
  0x1a   : > { %1656 = dma.hbm_to_vmem [thread:$0]  (!%p1654_p0), %s224_s17, 512, %s226_s16, %s211_s24  }
  0x1b   : > { %p253_p3 = pnand %p1605_p1, %p252_p2  ;;  %s236_s26 = scalar_lea.vmem [#allocation5], %s1599_s10 }
  0x1c   : > { %s247_s22 = sshll.u32 %s236_s26, 4  ;;  %s245_s12 = sshll.u32 %s243_s29, 4  ;;  %s248_s22 = int_to_ptr.vmem [resolvable:$true] %s247_s22  ;;  %s246_s12 = int_to_ptr.hbm [resolvable:$true] %s245_s12 }
  0x1d   : > { %s233_s13 = scalar_lea.sflag [#allocation6], %s210_s9  ;;  %256 = sbr.rel (%p253_p3) target bundleno = 396 (0x18c), region = 40 }
  0x1e   : > { %1659 = dma.hbm_to_vmem [thread:$0]  (!%p1654_p0), %s246_s12, 512, %s248_s22, %s233_s13  }
  0x1f   : > { %s2068_s28 = sand.u32 (!%p253_p3), 1, %s1942_s19  }
  0x20   : > { %s1606_s14 = sshll.u32 (!%p253_p3), %s2068_s28, 5  ;;  %s259_s15 = scalar_lea.sflag (!%p253_p3), [#allocation3], %s2068_s28 }
  0x21   : > { %s2072_s16 = scalar_lea.vmem (!%p253_p3), [#allocation2], %s1606_s14 }
  0x22   : > { %1925 = dma.done.wait (%p2038_p8), %s259_s15, 512  }
  0x23   : > { %1927 = vsyncadd (%p2038_p8), %s259_s15, 4294966784  ;;  %s269_s26 = scalar_lea.sflag [#allocation6], %s2068_s28  ;;  %s272_s22 = scalar_lea.vmem [#allocation5], %s1606_s14 }
  0x24   : > { %1929 = dma.done.wait (%p2038_p8), %s269_s26, 512  }
  0x25   : > { %1931 = vsyncadd (%p2038_p8), %s269_s26, 4294966784  ;;  %v311_v0 = vld [vmem:[%s272_s22] sm:$0xff]  ;;  %v312_v1 = vld [vmem:[%s272_s22 + $0x8] sm:$0xff]  ;;  %v1960_v5 = vmov 0   ;;  %vm341_vm0 = vcmask 1043456   ;;  %vm337_vm1 = vcmask 31744  }
  0x26   : > { %322 = vst [vmem:[#allocation1] ss:$2 sm:$0xff] %v311_v0  ;;  %v314_v2 = vld [vmem:[%s272_s22 + $0x18] sm:$0xff]  ;;  %v313_v3 = vld [vmem:[%s272_s22 + $0x10] sm:$0xff]  ;;  %1715 = vset.pattern.permute.xlu0 %v1960_v5  ;;  %v307_v6 = vld [vmem:[%s2072_s16] sm:$0xff]  ;;  %vm729_vm2 = vcmask 1041408  }
  0x27   : > { %324 = vst [vmem:[#allocation1 + $0x10] ss:$2 sm:$0xff] %v312_v1  ;;  %v317_v4 = vld [vmem:[%s2529_s4] sm:$0x3f]  ;;  %v308_v7 = vld [vmem:[%s2072_s16 + $0x8] sm:$0xff]  ;;  %v309_v16 = vld [vmem:[%s2072_s16 + $0x10] sm:$0xff] }
  0x28   : > { %328 = vst [vmem:[#allocation1 + $0x30] ss:$2 sm:$0xff] %v314_v2  ;;  %718 = vperm.xlu0 %1715, %v317_v4   ;;  %v316_v8 = vld [vmem:[%s2528_s3] sm:$0x3f]  ;;  %vm890_vm3 = vcmask 1043458   ;;  %vm1099_vm4 = vcmask 1045508  }
  0x29   : > { %326 = vst [vmem:[#allocation1 + $0x20] ss:$2 sm:$0xff] %v313_v3  ;;  %v310_v12 = vld [vmem:[%s2072_s16 + $0x18] sm:$0xff]  ;;  %s1608_s25 = sshll.u32 %s2068_s28, 3  ;;  %s1642_s29 = sshll.u32 %s1950_s21, 3 }
  0x2a   : > { %v315_v27 = vld [vmem:[%s2527_s2] sm:$0x3f]  ;;  %s2465_s27 = scalar_lea.vmem [#allocation7], %s1608_s25  ;;  %s1482_s14 = scalar_lea.hbm %s2530_s5, %s1642_s29 }
  0x2b   : > { %s1484_s15 = sshll.u32 %s2465_s27, 4  ;;  %s1486_s16 = sshll.u32 %s1482_s14, 4  ;;  %s1485_s15 = int_to_ptr.vmem [resolvable:$true] %s1484_s15  ;;  %s1487_s16 = int_to_ptr.hbm [resolvable:$true] %s1486_s16 }
  0x2c   : > { %s1471_s26 = scalar_lea.sflag [#allocation4], %s2068_s28  ;;  %s1886_s21 = sshra.s32 %s1487_s16, 4  ;;  %s1887_s21 = int_to_ptr.hbm [resolvable:$true] %s1886_s21 }
  0x2d   : > { %v329_v9 = vld.sshfl [vmem:[#allocation1] sm:$0xff pattern:$0x75316420]  ;;  %v330_v10 = vld.sshfl [vmem:[#allocation1 + $0x8] sm:$0xff pattern:$0x75316420]  ;;  %p1893_p7 = scmp.lt.s32.totalorder %s1887_s21, %s2530_s5 }
  0x2e   : > { %1609 = vmatpush.msk.msra.mxu0 %vm341_vm0, %v329_v9  ;;  %1611 = vmatpush.msk.msra.mxu1 %vm341_vm0, %v330_v10  ;;  %522 = vst [vmem:[#allocation1] ss:$2 sm:$0xff] %v307_v6  ;;  %v331_v11 = vld.sshfl [vmem:[#allocation1 + $0x10] sm:$0xff pattern:$0x75316420]  ;;  %s1888_s22 = scalar_lea.hbm %s1887_s21, 8 }
  0x2f   : > { %1613 = vmatpush.msk.msra.mxu2 %vm341_vm0, %v331_v11  ;;  %v332_v13 = vld.sshfl [vmem:[#allocation1 + $0x18] sm:$0xff pattern:$0x75316420]  ;;  %1610 = vmatmul.msk.f32.vlgmr.msra.gmra.mxu0 %vm337_vm1, %v316_v8  ;;  %v335_v14 = vld.sshfl [vmem:[#allocation1 + $0x30] sm:$0xff pattern:$0x75316420]  ;;  %p1889_p4 = scmp.ne.s32.totalorder %s1887_s21, %s1888_s22 }
  0x30   : > { %1615 = vmatpush.msk.msra.mxu3 %vm341_vm0, %v332_v13  ;;  %524 = vst [vmem:[#allocation1 + $0x10] ss:$2 sm:$0xff] %v308_v7  ;;  %1612 = vmatmul.msk.f32.vlgmr.msra.gmra.mxu1 %vm337_vm1, %v316_v8  ;;  %v336_v15 = vld.sshfl [vmem:[#allocation1 + $0x38] sm:$0xff pattern:$0x75316420]  ;;  %s1892_s30 = scalar_lea.hbm %s2530_s5, 16 }
  0x31   : > { %1614 = vmatmul.msk.f32.vlgmr.msra.gmra.mxu2 %vm337_vm1, %v316_v8  ;;  %1616 = vmatmul.msk.f32.vlgmr.msra.gmra.mxu3 %vm337_vm1, %v316_v8  ;;  %528 = vst [vmem:[#allocation1 + $0x30] ss:$2 sm:$0xff] %v310_v12  ;;  %v333_v17 = vld.sshfl [vmem:[#allocation1 + $0x20] sm:$0xff pattern:$0x75316420]  ;;  %p1890_p5 = pnand %p1889_p4, %p2042_p9  ;;  %p1894_p8 = scmp.lt.s32.totalorder %s1892_s30, %s1888_s22 }
  0x32   : > { %1621 = vmatpush.msk.msrb.mxu2 %vm341_vm0, %v335_v14  ;;  %1623 = vmatpush.msk.msrb.mxu3 %vm341_vm0, %v336_v15  ;;  %v334_v18 = vld.sshfl [vmem:[#allocation1 + $0x28] sm:$0xff pattern:$0x75316420] }
  0x33   : > { %1617 = vmatpush.msk.msrb.mxu0 %vm341_vm0, %v333_v17  ;;  %1619 = vmatpush.msk.msrb.mxu1 %vm341_vm0, %v334_v18  ;;  %526 = vst [vmem:[#allocation1 + $0x20] ss:$2 sm:$0xff] %v309_v16  ;;  %p1891_p6 = pneg %p1890_p5  ;;  %p1895_p10 = por %p1894_p8, %p1893_p7 }
  0x35   : > { %v529_v19 = vld.sshfl [vmem:[#allocation1] sm:$0xff pattern:$0x75316420]  ;;  %v530_v20 = vld.sshfl [vmem:[#allocation1 + $0x8] sm:$0xff pattern:$0x75316420]  ;;  %p1896_p13 = pnand %p1895_p10, %p1891_p6 }
  0x36   : > { %1625 = vmatpush.msk.msra.mxu0 %vm341_vm0, %v529_v19  ;;  %1627 = vmatpush.msk.msra.mxu1 %vm341_vm0, %v530_v20 }
  0x37   : > { %1618 = vmatmul.msk.f32.vlgmr.msrb.gmra.mxu0 %vm337_vm1, %v316_v8  ;;  %v531_v21 = vld.sshfl [vmem:[#allocation1 + $0x10] sm:$0xff pattern:$0x75316420]  ;;  %v532_v22 = vld.sshfl [vmem:[#allocation1 + $0x18] sm:$0xff pattern:$0x75316420] }
  0x38   : > { %1620 = vmatmul.msk.f32.vlgmr.msrb.gmra.mxu1 %vm337_vm1, %v316_v8  ;;  %1629 = vmatpush.msk.msra.mxu2 %vm341_vm0, %v531_v21  ;;  %v535_v23 = vld.sshfl [vmem:[#allocation1 + $0x30] sm:$0xff pattern:$0x75316420]  ;;  %v536_v24 = vld.sshfl [vmem:[#allocation1 + $0x38] sm:$0xff pattern:$0x75316420] }
  0x39   : > { %1622 = vmatmul.msk.f32.vlgmr.msrb.gmra.mxu2 %vm337_vm1, %v316_v8  ;;  %1624 = vmatmul.msk.f32.vlgmr.msrb.gmra.mxu3 %vm337_vm1, %v316_v8 }
  0x3a   : > { %1631 = vmatpush.msk.msra.mxu3 %vm341_vm0, %v532_v22  ;;  %1637 = vmatpush.msk.msrb.mxu2 %vm341_vm0, %v535_v23  ;;  %v533_v25 = vld.sshfl [vmem:[#allocation1 + $0x20] sm:$0xff pattern:$0x75316420]  ;;  %v534_v26 = vld.sshfl [vmem:[#allocation1 + $0x28] sm:$0xff pattern:$0x75316420] }
  0x3b   : > { %1633 = vmatpush.msk.msrb.mxu0 %vm341_vm0, %v533_v25  ;;  %1635 = vmatpush.msk.msrb.mxu1 %vm341_vm0, %v534_v26 }
  0x3c   : > { %1639 = vmatpush.msk.msrb.mxu3 %vm341_vm0, %v536_v24 }
  0x3f   : > { %1626 = vmatmul.msk.f32.vlgmr.msra.gmra.mxu0 %vm337_vm1, %v315_v27 }
  0x40   : > { %1628 = vmatmul.msk.f32.vlgmr.msra.gmra.mxu1 %vm337_vm1, %v315_v27 }
  0x41   : > { %1630 = vmatmul.msk.f32.vlgmr.msra.gmra.mxu2 %vm337_vm1, %v315_v27  ;;  %1632 = vmatmul.msk.f32.vlgmr.msra.gmra.mxu3 %vm337_vm1, %v315_v27 }
  0x47   : > { %1634 = vmatmul.msk.f32.vlgmr.msrb.gmra.mxu0 %vm337_vm1, %v315_v27 }
  0x48   : > { %1636 = vmatmul.msk.f32.vlgmr.msrb.gmra.mxu1 %vm337_vm1, %v315_v27 }
  0x49   : > { %1638 = vmatmul.msk.f32.vlgmr.msrb.gmra.mxu2 %vm337_vm1, %v315_v27  ;;  %1640 = vmatmul.msk.f32.vlgmr.msrb.gmra.mxu3 %vm337_vm1, %v315_v27 }
  0x9a   : > { %v2132_v34 = vpop.permute.xlu0 %718 }
  0xac   : > { %v375_v28 = vpop.f32.mrf.mxu0 }
  0xad   : > { %v395_v29 = vpop.f32.mrf.mxu1 }
  0xb4   : > { %v415_v30 = vpop.f32.mrf.mxu2  ;;  %v435_v31 = vpop.f32.mrf.mxu3 }
  0xb5   : > { %v2128_v32 = vpop.f32.mrf.mxu0  ;;  %v2130_v33 = vpop.f32.mrf.mxu1 }
  0xbc   : > { %v2134_v35 = vpop.f32.mrf.mxu2  ;;  %v2136_v36 = vpop.f32.mrf.mxu3 }
  0xbd   : > { %v573_v37 = vpop.f32.mrf.mxu0  ;;  %v593_v38 = vpop.f32.mrf.mxu1 }
  0xbe   : > { %v574_v39 = vadd.f32 %v573_v37, %v375_v28  ;;  %v594_v40 = vadd.f32 %v593_v38, %v395_v29 }
  0xc0   : > { %v2139_v41 = vadd.f32 %v2132_v34, %v574_v39  ;;  %v2142_v42 = vadd.f32 %v2132_v34, %v594_v40 }
  0xc2   : > { %v730_v43 = vsel %vm729_vm2, %v2139_v41, -inf  ;;  %v737_v44 = vsel %vm729_vm2, %v2142_v42, -inf  ;;  %v891_v45 = vsel %vm890_vm3, %v2139_v41, -inf  ;;  %v898_v46 = vsel %vm890_vm3, %v2142_v42, -inf }
  0xc3   : > { %v731_v47 = vrot.slane %v730_v43, 4  ;;  %v738_v48 = vrot.slane %v737_v44, 4  ;;  %v892_v49 = vrot.slane %v891_v45, 4  ;;  %v899_v50 = vrot.slane %v898_v46, 4 }
  0xc4   : > { %v1100_v51 = vsel %vm1099_vm4, %v2139_v41, -inf  ;;  %v1107_v52 = vsel %vm1099_vm4, %v2142_v42, -inf  ;;  %v613_v53 = vpop.f32.mrf.mxu2  ;;  %v633_v54 = vpop.f32.mrf.mxu3 }
  0xc5   : > { %v732_v55 = vmax.f32 %v730_v43, %v731_v47  ;;  %v739_v56 = vmax.f32 %v737_v44, %v738_v48  ;;  %v893_v57 = vmax.f32 %v891_v45, %v892_v49  ;;  %v900_v58 = vmax.f32 %v898_v46, %v899_v50 }
  0xc6   : > { %v1101_v59 = vrot.slane %v1100_v51, 4  ;;  %v1108_v60 = vrot.slane %v1107_v52, 4  ;;  %v614_v61 = vadd.f32 %v613_v53, %v415_v30  ;;  %v634_v62 = vadd.f32 %v633_v54, %v435_v31 }
  0xc7   : > { %v733_v63 = vrot.slane %v732_v55, 2  ;;  %v740_v0 = vrot.slane %v739_v56, 2  ;;  %v894_v1 = vrot.slane %v893_v57, 2  ;;  %v901_v2 = vrot.slane %v900_v58, 2 }
  0xc8   : > { %v1102_v3 = vmax.f32 %v1100_v51, %v1101_v59  ;;  %v1109_v4 = vmax.f32 %v1107_v52, %v1108_v60  ;;  %v2157_v5 = vadd.f32 %v2132_v34, %v614_v61  ;;  %v2160_v6 = vadd.f32 %v2132_v34, %v634_v62 }
  0xc9   : > { %v734_v7 = vmax.f32 %v732_v55, %v733_v63  ;;  %v741_v8 = vmax.f32 %v739_v56, %v740_v0  ;;  %v895_v9 = vmax.f32 %v893_v57, %v894_v1  ;;  %v902_v10 = vmax.f32 %v900_v58, %v901_v2 }
  0xca   : > { %v1103_v11 = vrot.slane %v1102_v3, 2  ;;  %v1110_v12 = vrot.slane %v1109_v4, 2  ;;  %v744_v13 = vsel %vm729_vm2, %v2157_v5, -inf  ;;  %v905_v14 = vsel %vm890_vm3, %v2157_v5, -inf }
  0xcb   : > { %v735_v15 = vrot.slane %v734_v7, 1  ;;  %v742_v16 = vrot.slane %v741_v8, 1  ;;  %v896_v17 = vrot.slane %v895_v9, 1  ;;  %v903_v18 = vrot.slane %v902_v10, 1 }
  0xcc   : > { %v1104_v19 = vmax.f32 %v1102_v3, %v1103_v11  ;;  %v1111_v20 = vmax.f32 %v1109_v4, %v1110_v12  ;;  %v745_v21 = vrot.slane %v744_v13, 4  ;;  %v906_v22 = vrot.slane %v905_v14, 4 }
  0xcd   : > { %v736_v23 = vmax.f32 %v734_v7, %v735_v15  ;;  %v743_v24 = vmax.f32 %v741_v8, %v742_v16  ;;  %v897_v25 = vmax.f32 %v895_v9, %v896_v17  ;;  %v904_v26 = vmax.f32 %v902_v10, %v903_v18 }
  0xce   : > { %v1105_v27 = vrot.slane %v1104_v19, 1  ;;  %v1112_v28 = vrot.slane %v1111_v20, 1  ;;  %v746_v29 = vmax.f32 %v744_v13, %v745_v21  ;;  %v907_v30 = vmax.f32 %v905_v14, %v906_v22 }
  0xcf   : > { %v786_v31 = vsub.f32 %v2139_v41, %v736_v23  ;;  %v787_v37 = vsub.f32 %v2142_v42, %v743_v24  ;;  %v947_v38 = vsub.f32 %v2139_v41, %v897_v25  ;;  %v948_v39 = vsub.f32 %v2142_v42, %v904_v26 }
  0xd0   : > { %v1106_v40 = vmax.f32 %v1104_v19, %v1105_v27  ;;  %v1113_v43 = vmax.f32 %v1111_v20, %v1112_v28  ;;  %v747_v44 = vrot.slane %v746_v29, 2  ;;  %v908_v45 = vrot.slane %v907_v30, 2 }
  0xd1   : > { %v794_v46 = vmul.f32 1.442695, %v786_v31  ;;  %v796_v47 = vmul.f32 1.442695, %v787_v37  ;;  %v955_v48 = vmul.f32 1.442695, %v947_v38 }
  0xd2   : > { %v957_v49 = vmul.f32 1.442695, %v948_v39  ;;  %v1156_v50 = vsub.f32 %v2139_v41, %v1106_v40  ;;  %v1157_v51 = vsub.f32 %v2142_v42, %v1113_v43  ;;  %v748_v52 = vmax.f32 %v746_v29, %v747_v44 }
  0xd3   : > { %1716 = vpow2.f32 %v794_v46  ;;  %v909_v53 = vmax.f32 %v907_v30, %v908_v45  ;;  %v1114_v54 = vsel %vm1099_vm4, %v2157_v5, -inf  ;;  %v751_v55 = vsel %vm729_vm2, %v2160_v6, -inf }
  0xd4   : > { %1718 = vpow2.f32 %v796_v47  ;;  %v1164_v56 = vmul.f32 1.442695, %v1156_v50  ;;  %v1166_v57 = vmul.f32 1.442695, %v1157_v51  ;;  %v749_v58 = vrot.slane %v748_v52, 1 }
  0xd5   : > { %1720 = vpow2.f32 %v955_v48  ;;  %v910_v59 = vrot.slane %v909_v53, 1  ;;  %v1115_v60 = vrot.slane %v1114_v54, 4  ;;  %v752_v61 = vrot.slane %v751_v55, 4 }
  0xd6   : > { %1722 = vpow2.f32 %v957_v49  ;;  %v750_v41 = vmax.f32 %v748_v52, %v749_v58  ;;  %v912_v17 = vsel %vm890_vm3, %v2160_v6, -inf  ;;  %v1121_v39 = vsel %vm1099_vm4, %v2160_v6, -inf }
  0xd7   : > { %1724 = vpow2.f32 %v1164_v56  ;;  %v911_v42 = vmax.f32 %v909_v53, %v910_v59  ;;  %v1116_v62 = vmax.f32 %v1114_v54, %v1115_v60  ;;  %v753_v3 = vmax.f32 %v751_v55, %v752_v61 }
  0xd8   : > { %1726 = vpow2.f32 %v1166_v57  ;;  %v788_v63 = vsub.f32 %v2157_v5, %v750_v41  ;;  %v913_v38 = vrot.slane %v912_v17, 4  ;;  %v1122_v61 = vrot.slane %v1121_v39, 4  ;;  %v653_v41 = vpop.f32.mrf.mxu0 }
  0xd9   : > { %v2177_v0 = vpop.eup %1716  ;;  %v949_v1 = vsub.f32 %v2157_v5, %v911_v42  ;;  %v1117_v2 = vrot.slane %v1116_v62, 2  ;;  %v754_v21 = vrot.slane %v753_v3, 2 }
  0xda   : > { %v2180_v4 = vpop.eup %1718  ;;  %v810_v7 = vsel %vm729_vm2, %v2177_v0, 0.0  ;;  %v798_v8 = vmul.f32 1.442695, %v788_v63 }
  0xdb   : > { %v2184_v9 = vpop.eup %1720  ;;  %v811_v10 = vrot.slane %v810_v7, 4  ;;  %v817_v11 = vsel %vm729_vm2, %v2180_v4, 0.0  ;;  %v959_v12 = vmul.f32 1.442695, %v949_v1  ;;  %v1118_v13 = vmax.f32 %v1116_v62, %v1117_v2 }
  0xdc   : > { %v2188_v14 = vpop.eup %1722  ;;  %v818_v15 = vrot.slane %v817_v11, 4  ;;  %v979_v16 = vrot.slane %v2184_v9, 2  ;;  %1728 = vpow2.f32 %v798_v8  ;;  %v755_v50 = vmax.f32 %v753_v3, %v754_v21 }
  0xdd   : > { %v2193_v18 = vpop.eup %1724  ;;  %v812_v19 = vadd.f32 %v811_v10, %v810_v7  ;;  %v980_v20 = vrot.slane %v2188_v14, 2  ;;  %1730 = vpow2.f32 %v959_v12  ;;  %v1119_v26 = vrot.slane %v1118_v13, 1 }
  0xde   : > { %v2196_v22 = vpop.eup %1726  ;;  %v819_v23 = vadd.f32 %v818_v15, %v817_v11  ;;  %v995_v24 = vsel %vm729_vm2, %v979_v16, 0.0  ;;  %v1188_v25 = vrot.slane %v2193_v18, 4  ;;  %v756_v1 = vrot.slane %v755_v50, 1 }
  0xdf   : > { %v813_v27 = vrot.slane %v812_v19, 2  ;;  %v996_v28 = vrot.slane %v995_v24, 4  ;;  %v1002_v29 = vsel %vm729_vm2, %v980_v20, 0.0  ;;  %v1189_v30 = vrot.slane %v2196_v22, 4 }
  0xe0   : > { %v1003_v31 = vrot.slane %v1002_v29, 4  ;;  %v1204_v37 = vsel %vm729_vm2, %v1188_v25, 0.0  ;;  %v820_v40 = vrot.slane %v819_v23, 2  ;;  %v1120_v55 = vmax.f32 %v1118_v13, %v1119_v26 }
  0xe1   : > { %v997_v43 = vadd.f32 %v996_v28, %v995_v24  ;;  %v1205_v44 = vrot.slane %v1204_v37, 4  ;;  %v1211_v45 = vsel %vm729_vm2, %v1189_v30, 0.0  ;;  %v814_v47 = vadd.f32 %v813_v27, %v812_v19 }
  0xe2   : > { %v2206_v46 = vpop.eup %1728  ;;  %v1004_v48 = vadd.f32 %v1003_v31, %v1002_v29  ;;  %v1212_v49 = vrot.slane %v1211_v45, 4  ;;  %v821_v59 = vadd.f32 %v820_v40, %v819_v23  ;;  %v1158_v7 = vsub.f32 %v2157_v5, %v1120_v55 }
  0xe3   : > { %v2208_v51 = vpop.eup %1730  ;;  %v998_v52 = vrot.slane %v997_v43, 2  ;;  %v1206_v53 = vadd.f32 %v1205_v44, %v1204_v37  ;;  %v824_v54 = vsel %vm729_vm2, %v2206_v46, 0.0  ;;  %v815_v42 = vrot.slane %v814_v47, 1 }
  0xe4   : > { %v1005_v56 = vrot.slane %v1004_v48, 2  ;;  %v1213_v57 = vadd.f32 %v1212_v49, %v1211_v45  ;;  %v825_v58 = vrot.slane %v824_v54, 4  ;;  %v981_v60 = vrot.slane %v2208_v51, 2 }
  0xe5   : > { %v999_v62 = vadd.f32 %v998_v52, %v997_v43  ;;  %v1207_v63 = vrot.slane %v1206_v53, 2  ;;  %v914_v8 = vmax.f32 %v912_v17, %v913_v38  ;;  %v654_v12 = vadd.f32 %v653_v41, %v2128_v32 }
  0xe6   : > { %v1006_v2 = vadd.f32 %v1005_v56, %v1004_v48  ;;  %v1009_v3 = vsel %vm729_vm2, %v981_v60, 0.0  ;;  %v1214_v10 = vrot.slane %v1213_v57, 2  ;;  %v826_v11 = vadd.f32 %v825_v58, %v824_v54 }
  0xe7   : > { %v822_v13 = vrot.slane %v821_v59, 1  ;;  %v1010_v15 = vrot.slane %v1009_v3, 4  ;;  %v1123_v16 = vmax.f32 %v1121_v39, %v1122_v61  ;;  %v816_v19 = vadd.f32 %v815_v42, %v814_v47 }
  0xe8   : > { %v1000_v20 = vrot.slane %v999_v62, 1  ;;  %v1208_v21 = vadd.f32 %v1207_v63, %v1206_v53  ;;  %v757_v23 = vmax.f32 %v755_v50, %v756_v1  ;;  %v1007_v24 = vrot.slane %v1006_v2, 1 }
  0xe9   : > { %v1011_v25 = vadd.f32 %v1010_v15, %v1009_v3  ;;  %v1168_v26 = vmul.f32 1.442695, %v1158_v7  ;;  %v915_v27 = vrot.slane %v914_v8, 2  ;;  %v1215_v28 = vadd.f32 %v1214_v10, %v1213_v57 }
  0xea   : > { %v827_v29 = vrot.slane %v826_v11, 2  ;;  %v789_v5 = vsub.f32 %v2160_v6, %v757_v23  ;;  %v2218_v17 = vadd.f32 %v2132_v34, %v654_v12  ;;  %v823_v30 = vadd.f32 %v822_v13, %v821_v59 }
  0xeb   : > { %v1012_v32 = vrot.slane %v1011_v25, 2  ;;  %v916_v31 = vmax.f32 %v914_v8, %v915_v27  ;;  %v1124_v37 = vrot.slane %v1123_v16, 2  ;;  %1732 = vrcp.f32 %v816_v19 }
  0xec   : > { %v1001_v38 = vadd.f32 %v1000_v20, %v999_v62  ;;  %v1209_v39 = vrot.slane %v1208_v21, 1  ;;  %v800_v40 = vmul.f32 1.442695, %v789_v5  ;;  %v1008_v43 = vadd.f32 %v1007_v24, %v1006_v2 }
  0xed   : > { %v1013_v44 = vadd.f32 %v1012_v32, %v1011_v25  ;;  %1734 = vpow2.f32 %v1168_v26  ;;  %v917_v45 = vrot.slane %v916_v31, 1  ;;  %v1216_v47 = vrot.slane %v1215_v28, 1 }
  0xee   : > { %v828_v48 = vadd.f32 %v827_v29, %v826_v11  ;;  %v1125_v49 = vmax.f32 %v1123_v16, %v1124_v37  ;;  %v758_v50 = vsel %vm729_vm2, %v2218_v17, -inf  ;;  %1736 = vpow2.f32 %v800_v40 }
  0xef   : > { %v1014_v52 = vrot.slane %v1013_v44, 1  ;;  %v918_v53 = vmax.f32 %v916_v31, %v917_v45  ;;  %v759_v54 = vrot.slane %v758_v50, 4  ;;  %1738 = vrcp.f32 %v823_v30 }
  0xf0   : > { %v1210_v55 = vadd.f32 %v1209_v39, %v1208_v21  ;;  %v1126_v56 = vrot.slane %v1125_v49, 1  ;;  %1740 = vrcp.f32 %v1001_v38  ;;  %v919_v58 = vsel %vm890_vm3, %v2218_v17, -inf }
  0xf1   : > { %v950_v57 = vsub.f32 %v2160_v6, %v918_v53  ;;  %v1733_v59 = vpop.eup %1732  ;;  %1742 = vrcp.f32 %v1008_v43  ;;  %v1015_v60 = vadd.f32 %v1014_v52, %v1013_v44  ;;  %v1217_v42 = vadd.f32 %v1216_v47, %v1215_v28 }
  0xf2   : > { %v1127_v61 = vmax.f32 %v1125_v49, %v1126_v56  ;;  %v829_v62 = vrot.slane %v828_v48, 1  ;;  %v760_v1 = vmax.f32 %v758_v50, %v759_v54  ;;  %1744 = vrcp.f32 %v1210_v55 }
  0xf3   : > { %v2225_v41 = vpop.eup %1734  ;;  %v961_v63 = vmul.f32 1.442695, %v950_v57  ;;  %v920_v7 = vrot.slane %v919_v58, 4  ;;  %v874_v30 = vmul.f32 %v1733_v59, %v2177_v0 }
  0xf4   : > { %v1190_v2 = vrot.slane %v2225_v41, 4  ;;  %v1159_v3 = vsub.f32 %v2160_v6, %v1127_v61  ;;  %v2229_v8 = vpop.eup %1736  ;;  %v761_v20 = vrot.slane %v760_v1, 2  ;;  %v830_v23 = vadd.f32 %v829_v62, %v828_v48 }
  0xf5   : > { %1746 = vpow2.f32 %v961_v63  ;;  %v1739_v10 = vpop.eup %1738  ;;  %v831_v12 = vsel %vm729_vm2, %v2229_v8, 0.0  ;;  %v921_v6 = vmax.f32 %v919_v58, %v920_v7  ;;  %v1128_v48 = vsel %vm1099_vm4, %v2218_v17, -inf }
  0xf6   : > { %1748 = vrcp.f32 %v1015_v60  ;;  %v1218_v11 = vsel %vm729_vm2, %v1190_v2, 0.0  ;;  %v1170_v13 = vmul.f32 1.442695, %v1159_v3  ;;  %v1741_v15 = vpop.eup %1740  ;;  %v832_v19 = vrot.slane %v831_v12, 4 }
  0xf7   : > { %1750 = vrcp.f32 %v1217_v42  ;;  %v1219_v16 = vrot.slane %v1218_v11, 4  ;;  %v1743_v21 = vpop.eup %1742  ;;  %v1059_v27 = vmul.f32 %v1741_v15, %v2184_v9  ;;  %v762_v28 = vmax.f32 %v760_v1, %v761_v20 }
  0xf8   : > { %1752 = vpow2.f32 %v1170_v13  ;;  %v833_v25 = vadd.f32 %v832_v19, %v831_v12  ;;  %v1745_v26 = vpop.eup %1744  ;;  %v922_v29 = vrot.slane %v921_v6, 2  ;;  %v1060_v32 = vmul.f32 %v1743_v21, %v2188_v14 }
  0xf9   : > { %v1220_v24 = vadd.f32 %v1219_v16, %v1218_v11  ;;  %v875_v39 = vmul.f32 %v1739_v10, %v2180_v4  ;;  %1754 = vrcp.f32 %v830_v23  ;;  %v763_v43 = vrot.slane %v762_v28, 1  ;;  %v673_v11 = vpop.f32.mrf.mxu1 }
  0xfa   : > { %v834_v37 = vrot.slane %v833_v25, 2  ;;  %v923_v47 = vmax.f32 %v921_v6, %v922_v29  ;;  %v1075_v0 = vrot.slane %v1059_v27, 2  ;;  %v1268_v14 = vmul.f32 %v1745_v26, %v2193_v18 }
  0xfb   : > { %v2235_v5 = vpop.eup %1746  ;;  %v1221_v31 = vrot.slane %v1220_v24, 2  ;;  %v764_v52 = vmax.f32 %v762_v28, %v763_v43  ;;  %v1076_v4 = vrot.slane %v1060_v32, 2  ;;  %v1129_v59 = vrot.slane %v1128_v48, 4 }
  0xfc   : > { %v1749_v38 = vpop.eup %1748  ;;  %v982_v40 = vrot.slane %v2235_v5, 2  ;;  %v835_v9 = vadd.f32 %v834_v37, %v833_v25  ;;  %v924_v58 = vrot.slane %v923_v47, 1  ;;  %v1091_v63 = vadd.f32 %v1075_v0, %v874_v30 }
  0xfd   : > { %v1751_v44 = vpop.eup %1750  ;;  %v1222_v45 = vadd.f32 %v1221_v31, %v1220_v24  ;;  %v1061_v53 = vmul.f32 %v1749_v38, %v2208_v51  ;;  %v790_v57 = vsub.f32 %v2218_v17, %v764_v52  ;;  %v1284_v51 = vrot.slane %v1268_v14, 4  ;;  %v693_v31 = vpop.f32.mrf.mxu2 }
  0xfe   : > { %v2243_v49 = vpop.eup %1752  ;;  %v1016_v50 = vsel %vm729_vm2, %v982_v40, 0.0  ;;  %v1269_v60 = vmul.f32 %v1751_v44, %v2196_v22  ;;  %v836_v42 = vrot.slane %v835_v9, 1  ;;  %v925_v3 = vmax.f32 %v923_v47, %v924_v58 }
  0xff   : > { %v1223_v54 = vrot.slane %v1222_v45, 1  ;;  %v1017_v55 = vrot.slane %v1016_v50, 4  ;;  %v1191_v56 = vrot.slane %v2243_v49, 4  ;;  %v1755_v18 = vpop.eup %1754  ;;  %v802_v2 = vmul.f32 1.442695, %v790_v57 }
 0x100   : > { %v1092_v12 = vadd.f32 %v1076_v4, %v875_v39  ;;  %v1077_v13 = vrot.slane %v1061_v53, 2  ;;  %v951_v15 = vsub.f32 %v2218_v17, %v925_v3  ;;  %v1130_v16 = vmax.f32 %v1128_v48, %v1129_v59 }
 0x101   : > { %v1224_v61 = vadd.f32 %v1223_v54, %v1222_v45  ;;  %v1018_v62 = vadd.f32 %v1017_v55, %v1016_v50  ;;  %v1225_v1 = vsel %vm729_vm2, %v1191_v56, 0.0  ;;  %v837_v22 = vadd.f32 %v836_v42, %v835_v9 }
 0x102   : > { %v1226_v10 = vrot.slane %v1225_v1, 4  ;;  %v1285_v21 = vrot.slane %v1269_v60, 4  ;;  %v963_v23 = vmul.f32 1.442695, %v951_v15  ;;  %v1131_v6 = vrot.slane %v1130_v16, 2 }
 0x103   : > { %1756 = vrcp.f32 %v1224_v61  ;;  %v1019_v7 = vrot.slane %v1018_v62, 2  ;;  %v674_v24 = vadd.f32 %v673_v11, %v2130_v33  ;;  %v2254_v25 = vadd.f32 %v1284_v51, %v1091_v63 }
 0x104   : > { %v1227_v20 = vadd.f32 %v1226_v10, %v1225_v1  ;;  %1758 = vpow2.f32 %v802_v2  ;;  %v876_v26 = vmul.f32 %v1755_v18, %v2206_v46  ;;  %v2257_v29 = vadd.f32 %v1285_v21, %v1092_v12 }
 0x105   : > { %v1020_v19 = vadd.f32 %v1019_v7, %v1018_v62  ;;  %1760 = vpow2.f32 %v963_v23  ;;  %v1132_v30 = vmax.f32 %v1130_v16, %v1131_v6  ;;  %v2260_v32 = vadd.f32 %v2132_v34, %v674_v24 }
 0x106   : > { %v1228_v28 = vrot.slane %v1227_v20, 2  ;;  %v1093_v38 = vadd.f32 %v1077_v13, %v876_v26  ;;  %1762 = vrcp.f32 %v837_v22  ;;  %v694_v48 = vadd.f32 %v693_v31, %v2134_v35 }
 0x107   : > { %v1021_v27 = vrot.slane %v1020_v19, 1  ;;  %v1133_v43 = vrot.slane %v1132_v30, 1  ;;  %v765_v46 = vsel %vm729_vm2, %v2260_v32, -inf  ;;  %v926_v44 = vsel %vm890_vm3, %v2260_v32, -inf }
 0x108   : > { %v1229_v40 = vadd.f32 %v1228_v28, %v1227_v20  ;;  %v766_v47 = vrot.slane %v765_v46, 4  ;;  %v1135_v54 = vsel %vm1099_vm4, %v2260_v32, -inf }
 0x109   : > { %v1757_v37 = vpop.eup %1756  ;;  %v1022_v39 = vadd.f32 %v1021_v27, %v1020_v19  ;;  %v1134_v50 = vmax.f32 %v1132_v30, %v1133_v43  ;;  %v1136_v35 = vrot.slane %v1135_v54, 4 }
 0x10a   : > { %v1270_v33 = vmul.f32 %v1757_v37, %v2225_v41  ;;  %v2267_v45 = vpop.eup %1758  ;;  %v1230_v9 = vrot.slane %v1229_v40, 1  ;;  %v927_v41 = vrot.slane %v926_v44, 4  ;;  %v767_v53 = vmax.f32 %v765_v46, %v766_v47 }
 0x10b   : > { %1764 = vrcp.f32 %v1022_v39  ;;  %v838_v14 = vsel %vm729_vm2, %v2267_v45, 0.0  ;;  %v2274_v55 = vpop.eup %1760  ;;  %v1160_v57 = vsub.f32 %v2218_v17, %v1134_v50  ;;  %v1137_v1 = vmax.f32 %v1135_v54, %v1136_v35 }
 0x10c   : > { %v1286_v0 = vrot.slane %v1270_v33, 4  ;;  %v1231_v52 = vadd.f32 %v1230_v9, %v1229_v40  ;;  %v839_v4 = vrot.slane %v838_v14, 4  ;;  %v928_v58 = vmax.f32 %v926_v44, %v927_v41  ;;  %v1763_v59 = vpop.eup %1762 }
 0x10d   : > { %v983_v61 = vrot.slane %v2274_v55, 2  ;;  %v768_v42 = vrot.slane %v767_v53, 2  ;;  %v1172_v18 = vmul.f32 1.442695, %v1160_v57  ;;  %v2284_v17 = vadd.f32 %v2132_v34, %v694_v48 }
 0x10e   : > { %v2276_v56 = vadd.f32 %v1286_v0, %v1093_v38  ;;  %1766 = vrcp.f32 %v1231_v52  ;;  %v840_v60 = vadd.f32 %v839_v4, %v838_v14  ;;  %v929_v63 = vrot.slane %v928_v58, 2 }
 0x10f   : > { %v1023_v51 = vsel %vm729_vm2, %v983_v61, 0.0  ;;  %v769_v7 = vmax.f32 %v767_v53, %v768_v42  ;;  %1768 = vpow2.f32 %v1172_v18  ;;  %v1138_v22 = vrot.slane %v1137_v1, 2 }
 0x110   : > { %v1324_v62 = vsel %vm729_vm2, %v2276_v56, -inf  ;;  %v1024_v11 = vrot.slane %v1023_v51, 4  ;;  %v930_v12 = vmax.f32 %v928_v58, %v929_v63  ;;  %v841_v15 = vrot.slane %v840_v60, 2 }
 0x111   : > { %v1765_v2 = vpop.eup %1764  ;;  %v1325_v3 = vrot.slane %v1324_v62, 4  ;;  %v770_v16 = vrot.slane %v769_v7, 1  ;;  %v877_v19 = vmul.f32 %v1763_v59, %v2229_v8  ;;  %v1139_v27 = vmax.f32 %v1137_v1, %v1138_v22 }
 0x112   : > { %v1062_v10 = vmul.f32 %v1765_v2, %v2235_v5  ;;  %v1025_v21 = vadd.f32 %v1024_v11, %v1023_v51  ;;  %v931_v23 = vrot.slane %v930_v12, 1  ;;  %v772_v28 = vsel %vm729_vm2, %v2284_v17, -inf }
 0x113   : > { %v1326_v13 = vmax.f32 %v1324_v62, %v1325_v3  ;;  %v771_v26 = vmax.f32 %v769_v7, %v770_v16  ;;  %v1310_v38 = vsel %vm729_vm2, %v2254_v25, -inf  ;;  %v842_v39 = vadd.f32 %v841_v15, %v840_v60 }
 0x114   : > { %v1078_v20 = vrot.slane %v1062_v10, 2  ;;  %v1767_v6 = vpop.eup %1766  ;;  %v1026_v31 = vrot.slane %v1025_v21, 2  ;;  %v932_v37 = vmax.f32 %v930_v12, %v931_v23  ;;  %v1140_v40 = vrot.slane %v1139_v27, 1 }
 0x115   : > { %v1327_v24 = vrot.slane %v1326_v13, 2  ;;  %v1271_v30 = vmul.f32 %v1767_v6, %v2243_v49  ;;  %v791_v8 = vsub.f32 %v2260_v32, %v771_v26  ;;  %v2294_v33 = vpop.eup %1768  ;;  %v773_v9 = vrot.slane %v772_v28, 4 }
 0x116   : > { %v1094_v5 = vadd.f32 %v1078_v20, %v877_v19  ;;  %v1027_v46 = vadd.f32 %v1026_v31, %v1025_v21  ;;  %v952_v44 = vsub.f32 %v2260_v32, %v932_v37  ;;  %v1317_v47 = vsel %vm729_vm2, %v2257_v29, -inf }
 0x117   : > { %v1287_v43 = vrot.slane %v1271_v30, 4  ;;  %v1328_v49 = vmax.f32 %v1326_v13, %v1327_v24  ;;  %v1192_v48 = vrot.slane %v2294_v33, 4  ;;  %v804_v0 = vmul.f32 1.442695, %v791_v8  ;;  %v713_v8 = vpop.f32.mrf.mxu3 }
 0x118   : > { %v1028_v50 = vrot.slane %v1027_v46, 1  ;;  %v965_v41 = vmul.f32 1.442695, %v952_v44  ;;  %v1141_v52 = vmax.f32 %v1139_v27, %v1140_v40  ;;  %v843_v4 = vrot.slane %v842_v39, 1 }
 0x119   : > { %v2300_v14 = vadd.f32 %v1287_v43, %v1094_v5  ;;  %v1232_v53 = vsel %vm729_vm2, %v1192_v48, 0.0  ;;  %1770 = vpow2.f32 %v804_v0  ;;  %v774_v54 = vmax.f32 %v772_v28, %v773_v9 }
 0x11a   : > { %v1029_v58 = vadd.f32 %v1028_v50, %v1027_v46  ;;  %v1233_v35 = vrot.slane %v1232_v53, 4  ;;  %1772 = vpow2.f32 %v965_v41  ;;  %v1329_v59 = vrot.slane %v1328_v49, 1 }
 0x11b   : > { %v1331_v57 = vsel %vm729_vm2, %v2300_v14, -inf  ;;  %v1161_v61 = vsub.f32 %v2260_v32, %v1141_v52  ;;  %v775_v42 = vrot.slane %v774_v54, 2  ;;  %v1311_v62 = vrot.slane %v1310_v38, 4 }
 0x11c   : > { %v1332_v60 = vrot.slane %v1331_v57, 4  ;;  %1774 = vrcp.f32 %v1029_v58  ;;  %v1234_v18 = vadd.f32 %v1233_v35, %v1232_v53  ;;  %v933_v63 = vsel %vm890_vm3, %v2284_v17, -inf }
 0x11d   : > { %v1318_v1 = vrot.slane %v1317_v47, 4  ;;  %v1174_v3 = vmul.f32 1.442695, %v1161_v61  ;;  %v776_v51 = vmax.f32 %v774_v54, %v775_v42  ;;  %v1308_v7 = vlaneseq }
 0x11e   : > { %v1333_v2 = vmax.f32 %v1331_v57, %v1332_v60  ;;  %v844_v10 = vadd.f32 %v843_v4, %v842_v39  ;;  %v1235_v11 = vrot.slane %v1234_v18, 2  ;;  %v934_v12 = vrot.slane %v933_v63, 4 }
 0x11f   : > { %v2308_v13 = vpop.eup %1770  ;;  %v1330_v15 = vmax.f32 %v1328_v49, %v1329_v59  ;;  %1776 = vpow2.f32 %v1174_v3  ;;  %v777_v32 = vrot.slane %v776_v51, 1  ;;  %v1312_v19 = vmax.f32 %v1310_v38, %v1311_v62 }
 0x120   : > { %v1334_v16 = vrot.slane %v1333_v2, 2  ;;  %v2310_v22 = vpop.eup %1772  ;;  %v1236_v20 = vadd.f32 %v1235_v11, %v1234_v18  ;;  %v845_v21 = vsel %vm729_vm2, %v2308_v13, 0.0  ;;  %v935_v23 = vmax.f32 %v933_v63, %v934_v12 }
 0x121   : > { %v2314_v6 = vmax.f32 %v1317_v47, %v1318_v1  ;;  %v846_v26 = vrot.slane %v845_v21, 4  ;;  %v984_v27 = vrot.slane %v2310_v22, 2  ;;  %v2317_v5 = vshrl.u32 %v1308_v7, 7 }
 0x122   : > { %v1335_v24 = vmax.f32 %v1333_v2, %v1334_v16  ;;  %v1775_v28 = vpop.eup %1774  ;;  %1778 = vrcp.f32 %v844_v10  ;;  %v1237_v30 = vrot.slane %v1236_v20, 1  ;;  %v778_v31 = vmax.f32 %v776_v51, %v777_v32 }
 0x123   : > { %vm1368_vm5 = vcmp.ge.f32.partialorder %v2276_v56, %v1330_v15  ;;  %v847_v37 = vadd.f32 %v846_v26, %v845_v21  ;;  %v1030_v38 = vsel %vm729_vm2, %v984_v27, 0.0  ;;  %v936_v39 = vrot.slane %v935_v23, 2 }
 0x124   : > { %v1336_v40 = vrot.slane %v1335_v24, 1  ;;  %v1238_v43 = vadd.f32 %v1237_v30, %v1236_v20  ;;  %v1031_v46 = vrot.slane %v1030_v38, 4  ;;  %v792_v44 = vsub.f32 %v2284_v17, %v778_v31 }
 0x125   : > { %v2322_v9 = vpop.eup %1776  ;;  %v1313_v47 = vrot.slane %v1312_v19, 2  ;;  %v1320_v49 = vrot.slane %v2314_v6, 2  ;;  %v1063_v48 = vmul.f32 %v1775_v28, %v2274_v55  ;;  %v848_v0 = vrot.slane %v847_v37, 2 }
 0x126   : > { %1780 = vrcp.f32 %v1238_v43  ;;  %v1032_v50 = vadd.f32 %v1031_v46, %v1030_v38  ;;  %v1193_v41 = vrot.slane %v2322_v9, 4  ;;  %v714_v52 = vadd.f32 %v713_v8, %v2136_v36 }
 0x127   : > { %v1376_v4 = vsel %vm1368_vm5, %v2317_v5, 2  ;;  %v849_v53 = vadd.f32 %v848_v0, %v847_v37  ;;  %v806_v54 = vmul.f32 1.442695, %v792_v44  ;;  %v1142_v57 = vsel %vm1099_vm4, %v2284_v17, -inf }
 0x128   : > { %v1779_v58 = vpop.eup %1778  ;;  %v1337_v35 = vmax.f32 %v1335_v24, %v1336_v40  ;;  %v1033_v59 = vrot.slane %v1032_v50, 2  ;;  %v1239_v55 = vsel %vm729_vm2, %v1193_v41, 0.0  ;;  %v937_v60 = vmax.f32 %v935_v23, %v936_v39 }
 0x129   : > { %v1079_v61 = vrot.slane %v1063_v48, 2  ;;  %v850_v42 = vrot.slane %v849_v53, 1  ;;  %v1240_v62 = vrot.slane %v1239_v55, 4  ;;  %1782 = vpow2.f32 %v806_v54 }
 0x12a   : > { %v2334_v36 = vmax.f32 %v1312_v19, %v1313_v47  ;;  %v1034_v18 = vadd.f32 %v1033_v59, %v1032_v50  ;;  %v938_v56 = vrot.slane %v937_v60, 1  ;;  %v1143_v63 = vrot.slane %v1142_v57, 4 }
 0x12b   : > { %v878_v1 = vmul.f32 %v1779_v58, %v2267_v45  ;;  %v851_v2 = vadd.f32 %v850_v42, %v849_v53  ;;  %v1241_v3 = vadd.f32 %v1240_v62, %v1239_v55  ;;  %v2338_v51 = vadd.f32 %v2132_v34, %v714_v52 }
 0x12c   : > { %v1781_v7 = vpop.eup %1780  ;;  %v2341_v10 = vsel %vm729_vm2, %v1376_v4, 2147483647  ;;  %v1035_v11 = vrot.slane %v1034_v18, 1  ;;  %v939_v12 = vmax.f32 %v937_v60, %v938_v56  ;;  %v1144_v15 = vmax.f32 %v1142_v57, %v1143_v63 }
 0x12d   : > { %vm1369_vm6 = vcmp.ge.f32.partialorder %v2300_v14, %v1337_v35  ;;  %v1095_v16 = vadd.f32 %v1079_v61, %v878_v1  ;;  %v1272_v32 = vmul.f32 %v1781_v7, %v2294_v33  ;;  %v1242_v19 = vrot.slane %v1241_v3, 2 }
 0x12e   : > { %1784 = vrcp.f32 %v851_v2  ;;  %v1036_v45 = vadd.f32 %v1035_v11, %v1034_v18  ;;  %v953_v20 = vsub.f32 %v2284_v17, %v939_v12  ;;  %v1145_v21 = vrot.slane %v1144_v15, 2 }
 0x12f   : > { %v2346_v34 = vpop.eup %1782  ;;  %v1403_v23 = vrot.slane %v2341_v10, 4  ;;  %v1288_v24 = vrot.slane %v1272_v32, 4  ;;  %v1243_v26 = vadd.f32 %v1242_v19, %v1241_v3  ;;  %v779_v27 = vsel %vm729_vm2, %v2338_v51, -inf }
 0x130   : > { %1786 = vrcp.f32 %v1036_v45  ;;  %v852_v28 = vsel %vm729_vm2, %v2346_v34, 0.0  ;;  %v967_v33 = vmul.f32 1.442695, %v953_v20  ;;  %v940_v30 = vsel %vm890_vm3, %v2338_v51, -inf }
 0x131   : > { %v1377_v31 = vsel %vm1369_vm6, %v2317_v5, 2  ;;  %v2358_v37 = vadd.f32 %v1288_v24, %v1095_v16  ;;  %v1244_v38 = vrot.slane %v1243_v26, 1  ;;  %v853_v39 = vrot.slane %v852_v28, 4 }
 0x132   : > { %v2361_v8 = vmax.f32 %v2314_v6, %v1320_v49  ;;  %1788 = vpow2.f32 %v967_v33  ;;  %v1146_v40 = vmax.f32 %v1144_v15, %v1145_v21  ;;  %v780_v43 = vrot.slane %v779_v27, 4 }
 0x133   : > { %v1338_v46 = vsel %vm729_vm2, %v2358_v37, -inf  ;;  %v1245_v44 = vadd.f32 %v1244_v38, %v1243_v26  ;;  %v854_v47 = vadd.f32 %v853_v39, %v852_v28  ;;  %v941_v48 = vrot.slane %v940_v30, 4 }
 0x134   : > { %v1785_v0 = vpop.eup %1784  ;;  %vm2368_vm7 = vcmp.lt.s32.totalorder %v2341_v10, %v1403_v23  ;;  %v2373_v6 = vsel %vm729_vm2, %v1377_v31, 2147483647  ;;  %v1339_v49 = vrot.slane %v1338_v46, 4  ;;  %v1147_v50 = vrot.slane %v1146_v40, 1 }
 0x135   : > { %v781_v41 = vmax.f32 %v779_v27, %v780_v43  ;;  %1790 = vrcp.f32 %v1245_v44  ;;  %v855_v52 = vrot.slane %v854_v47, 2  ;;  %v942_v4 = vmax.f32 %v940_v30, %v941_v48 }
 0x136   : > { %v1149_v53 = vsel %vm1099_vm4, %v2338_v51, -inf  ;;  %v1787_v54 = vpop.eup %1786  ;;  %v1340_v57 = vmax.f32 %v1338_v46, %v1339_v49  ;;  %v1148_v58 = vmax.f32 %v1146_v40, %v1147_v50  ;;  %v879_v55 = vmul.f32 %v1785_v0, %v2308_v13 }
 0x137   : > { %v782_v35 = vrot.slane %v781_v41, 2  ;;  %v1150_v59 = vrot.slane %v1149_v53, 4  ;;  %v1064_v60 = vmul.f32 %v1787_v54, %v2310_v22  ;;  %v856_v61 = vadd.f32 %v855_v52, %v854_v47 }
 0x138   : > { %v943_v42 = vrot.slane %v942_v4, 2  ;;  %v2379_v62 = vpop.eup %1788  ;;  %v1341_v18 = vrot.slane %v1340_v57, 2  ;;  %v1162_v56 = vsub.f32 %v2284_v17, %v1148_v58  ;;  %v1413_v22 = vrot.slane %v2373_v6, 4 }
 0x139   : > { %v783_v63 = vmax.f32 %v781_v41, %v782_v35  ;;  %v1151_v1 = vmax.f32 %v1149_v53, %v1150_v59  ;;  %v1080_v2 = vrot.slane %v1064_v60, 2  ;;  %v857_v3 = vrot.slane %v856_v61, 1 }
 0x13a   : > { %v985_v7 = vrot.slane %v2379_v62, 2  ;;  %v944_v11 = vmax.f32 %v942_v4, %v943_v42  ;;  %v1342_v12 = vmax.f32 %v1340_v57, %v1341_v18  ;;  %v1176_v15 = vmul.f32 1.442695, %v1162_v56 }
 0x13b   : > { %v784_v16 = vrot.slane %v783_v63, 1  ;;  %v1152_v13 = vrot.slane %v1151_v1, 2  ;;  %v1791_v32 = vpop.eup %1790  ;;  %v1096_v19 = vadd.f32 %v1080_v2, %v879_v55  ;;  %v1315_v26 = vrot.slane %v2334_v36, 1 }
 0x13c   : > { %v1037_v45 = vsel %vm729_vm2, %v985_v7, 0.0  ;;  %v945_v20 = vrot.slane %v944_v11, 1  ;;  %v1343_v21 = vrot.slane %v1342_v12, 1  ;;  %v1273_v17 = vmul.f32 %v1791_v32, %v2322_v9 }
 0x13d   : > { %v1038_v24 = vrot.slane %v1037_v45, 4  ;;  %1792 = vpow2.f32 %v1176_v15  ;;  %v785_v27 = vmax.f32 %v783_v63, %v784_v16  ;;  %v1153_v33 = vmax.f32 %v1151_v1, %v1152_v13 }
 0x13e   : > { %v946_v28 = vmax.f32 %v944_v11, %v945_v20  ;;  %v1344_v30 = vmax.f32 %v1342_v12, %v1343_v21  ;;  %v1289_v31 = vrot.slane %v1273_v17, 4  ;;  %v858_v38 = vadd.f32 %v857_v3, %v856_v61 }
 0x13f   : > { %v1039_v39 = vadd.f32 %v1038_v24, %v1037_v45  ;;  %v1405_v40 = vsel %vm2368_vm7, %v2341_v10, %v1403_v23  ;;  %v793_v43 = vsub.f32 %v2338_v51, %v785_v27  ;;  %v1154_v46 = vrot.slane %v1153_v33, 1 }
 0x140   : > { %v954_v9 = vsub.f32 %v2338_v51, %v946_v28  ;;  %vm2395_vm8 = vcmp.lt.s32.totalorder %v2373_v6, %v1413_v22  ;;  %vm1370_vm9 = vcmp.ge.f32.partialorder %v2358_v37, %v1344_v30  ;;  %v2400_v47 = vadd.f32 %v1289_v31, %v1096_v19 }
 0x141   : > { %v1040_v48 = vrot.slane %v1039_v39, 2  ;;  %v1378_v0 = vsel %vm1370_vm9, %v2317_v5, 2  ;;  %v808_v49 = vmul.f32 1.442695, %v793_v43  ;;  %v1155_v10 = vmax.f32 %v1153_v33, %v1154_v46 }
 0x142   : > { %v969_v14 = vmul.f32 1.442695, %v954_v9  ;;  %v1422_v50 = vsel %vm729_vm2, %v1378_v0, 2147483647  ;;  %v1345_v41 = vsel %vm729_vm2, %v2400_v47, -inf  ;;  %1794 = vrcp.f32 %v858_v38 }
 0x143   : > { %v2403_v23 = vpop.eup %1792  ;;  %v1041_v52 = vadd.f32 %v1040_v48, %v1039_v39  ;;  %v1322_v4 = vrot.slane %v2361_v8, 1  ;;  %v1346_v37 = vrot.slane %v1345_v41, 4  ;;  %1796 = vpow2.f32 %v808_v49 }
 0x144   : > { %v1194_v53 = vrot.slane %v2403_v23, 4  ;;  %v1423_v54 = vrot.slane %v1422_v50, 4  ;;  %1798 = vpow2.f32 %v969_v14  ;;  %v1163_v58 = vsub.f32 %v2338_v51, %v1155_v10 }
 0x145   : > { %v1042_v57 = vrot.slane %v1041_v52, 1  ;;  %v1406_v35 = vrot.slane %v1405_v40, 2  ;;  %v2414_v59 = vsel %vm2395_vm8, %v2373_v6, %v1413_v22  ;;  %v1347_v55 = vmax.f32 %v1345_v41, %v1346_v37 }
 0x146   : > { %v1246_v60 = vsel %vm729_vm2, %v1194_v53, 0.0  ;;  %v1316_v61 = vmax.f32 %v2334_v36, %v1315_v26  ;;  %v1178_v56 = vmul.f32 1.442695, %v1163_v58  ;;  %v1323_v63 = vmax.f32 %v2361_v8, %v1322_v4 }
 0x147   : > { %v1043_v42 = vadd.f32 %v1042_v57, %v1041_v52  ;;  %v1247_v18 = vrot.slane %v1246_v60, 4  ;;  %v1348_v1 = vrot.slane %v1347_v55, 2  ;;  %v1416_v51 = vrot.slane %v2414_v59, 2 }
 0x148   : > { %v1795_v2 = vpop.eup %1794  ;;  %vm1424_vm10 = vcmp.lt.s32.totalorder %v1422_v50, %v1423_v54  ;;  %vm1407_vm11 = vcmp.lt.s32.totalorder %v1405_v40, %v1406_v35  ;;  %vm1366_vm12 = vcmp.ge.f32.partialorder %v2254_v25, %v1316_v61  ;;  %vm1367_vm13 = vcmp.ge.f32.partialorder %v2257_v29, %v1323_v63 }
 0x149   : > { %1800 = vrcp.f32 %v1043_v42  ;;  %v1248_v3 = vadd.f32 %v1247_v18, %v1246_v60  ;;  %v2420_v7 = vpop.eup %1796  ;;  %v1349_v6 = vmax.f32 %v1347_v55, %v1348_v1  ;;  %v2427_v12 = vsel %vm1424_vm10, %v1422_v50, %v1423_v54 }
 0x14a   : > { %1802 = vpow2.f32 %v1178_v56  ;;  %v2422_v11 = vpop.eup %1798  ;;  %v859_v8 = vsel %vm729_vm2, %v2420_v7, 0.0  ;;  %v2431_v32 = vsel %vm1407_vm11, %v1405_v40, %v1406_v35  ;;  %vm2434_vm14 = vcmp.lt.s32.totalorder %v2414_v59, %v1416_v51 }
 0x14b   : > { %v1249_v36 = vrot.slane %v1248_v3, 2  ;;  %v1350_v15 = vrot.slane %v1349_v6, 1  ;;  %v860_v16 = vrot.slane %v859_v8, 4  ;;  %v986_v13 = vrot.slane %v2422_v11, 2 }
 0x14c   : > { %v880_v20 = vmul.f32 %v1795_v2, %v2346_v34  ;;  %v1426_v26 = vrot.slane %v2427_v12, 2  ;;  %v1374_v33 = vsel %vm1366_vm12, %v2317_v5, 2  ;;  %v1375_v25 = vsel %vm1367_vm13, %v2317_v5, 2 }
 0x14d   : > { %v1250_v19 = vadd.f32 %v1249_v36, %v1248_v3  ;;  %v1351_v45 = vmax.f32 %v1349_v6, %v1350_v15  ;;  %v861_v21 = vadd.f32 %v860_v16, %v859_v8  ;;  %v1044_v17 = vsel %vm729_vm2, %v986_v13, 0.0 }
 0x14e   : > { %v1045_v28 = vrot.slane %v1044_v17, 4  ;;  %v1382_v34 = vsel %vm729_vm2, %v1374_v33, 2147483647  ;;  %v1392_v52 = vsel %vm729_vm2, %v1375_v25, 2147483647  ;;  %v1418_v54 = vsel %vm2434_vm14, %v2414_v59, %v1416_v51 }
 0x14f   : > { %v1801_v24 = vpop.eup %1800  ;;  %v1251_v27 = vrot.slane %v1250_v19, 1  ;;  %vm1371_vm15 = vcmp.ge.f32.partialorder %v2400_v47, %v1351_v45  ;;  %v862_v38 = vrot.slane %v861_v21, 2  ;;  %v1383_v48 = vrot.slane %v1382_v34, 4 }
 0x150   : > { %v2444_v30 = vpop.eup %1802  ;;  %v1065_v31 = vmul.f32 %v1801_v24, %v2379_v62  ;;  %v1379_v39 = vsel %vm1371_vm15, %v2317_v5, 2  ;;  %v1046_v43 = vadd.f32 %v1045_v28, %v1044_v17  ;;  %v1393_v35 = vrot.slane %v1392_v52, 4 }
 0x151   : > { %v1252_v40 = vadd.f32 %v1251_v27, %v1250_v19  ;;  %v1195_v9 = vrot.slane %v2444_v30, 4  ;;  %v1432_v46 = vsel %vm729_vm2, %v1379_v39, 2147483647  ;;  %v863_v44 = vadd.f32 %v862_v38, %v861_v21 }
 0x152   : > { %v1433_v47 = vrot.slane %v1432_v46, 4  ;;  %v1047_v62 = vrot.slane %v1046_v43, 2  ;;  %v1081_v49 = vrot.slane %v1065_v31, 2  ;;  %vm1384_vm0 = vcmp.lt.s32.totalorder %v1382_v34, %v1383_v48 }
 0x153   : > { %1804 = vrcp.f32 %v1252_v40  ;;  %v1253_v0 = vsel %vm729_vm2, %v1195_v9, 0.0  ;;  %v864_v14 = vrot.slane %v863_v44, 1  ;;  %v1385_v41 = vsel %vm1384_vm0, %v1382_v34, %v1383_v48 }
 0x154   : > { %v1254_v10 = vrot.slane %v1253_v0, 4  ;;  %vm1434_vm1 = vcmp.lt.s32.totalorder %v1432_v46, %v1433_v47  ;;  %v1048_v50 = vadd.f32 %v1047_v62, %v1046_v43  ;;  %v1386_v53 = vrot.slane %v1385_v41, 2 }
 0x155   : > { %v1435_v4 = vsel %vm1434_vm1, %v1432_v46, %v1433_v47  ;;  %v865_v37 = vadd.f32 %v864_v14, %v863_v44  ;;  %vm1427_vm3 = vcmp.lt.s32.totalorder %v2427_v12, %v1426_v26  ;;  %v1097_v55 = vadd.f32 %v1081_v49, %v880_v20 }
 0x156   : > { %v1255_v29 = vadd.f32 %v1254_v10, %v1253_v0  ;;  %v1436_v57 = vrot.slane %v1435_v4, 2  ;;  %v1049_v58 = vrot.slane %v1048_v50, 1  ;;  %vm1387_vm4 = vcmp.lt.s32.totalorder %v1385_v41, %v1386_v53 }
 0x157   : > { %v1388_v18 = vsel %vm1387_vm4, %v1385_v41, %v1386_v53  ;;  %vm1394_vm6 = vcmp.lt.s32.totalorder %v1392_v52, %v1393_v35  ;;  %1806 = vrcp.f32 %v865_v37  ;;  %v1428_v59 = vsel %vm1427_vm3, %v2427_v12, %v1426_v26 }
 0x158   : > { %v1256_v60 = vrot.slane %v1255_v29, 2  ;;  %vm1437_vm5 = vcmp.lt.s32.totalorder %v1435_v4, %v1436_v57  ;;  %v1050_v42 = vadd.f32 %v1049_v58, %v1048_v50  ;;  %v1389_v1 = vrot.slane %v1388_v18, 1 }
 0x159   : > { %v1805_v61 = vpop.eup %1804  ;;  %v1438_v2 = vsel %vm1437_vm5, %v1435_v4, %v1436_v57  ;;  %v1395_v51 = vsel %vm1394_vm6, %v1392_v52, %v1393_v35  ;;  %v1409_v8 = vrot.slane %v2431_v32, 1  ;;  %v1419_v15 = vrot.slane %v1418_v54, 1 }
 0x15a   : > { %v1274_v56 = vmul.f32 %v1805_v61, %v2403_v23  ;;  %v1257_v63 = vadd.f32 %v1256_v60, %v1255_v29  ;;  %1808 = vrcp.f32 %v1050_v42  ;;  %vm1390_vm7 = vcmp.lt.s32.totalorder %v1388_v18, %v1389_v1 }
 0x15b   : > { %v1396_v36 = vrot.slane %v1395_v51, 2  ;;  %v1391_v16 = vsel %vm1390_vm7, %v1388_v18, %v1389_v1  ;;  %v1429_v23 = vrot.slane %v1428_v59, 1  ;;  %v1439_v12 = vrot.slane %v1438_v2, 1 }
 0x15c   : > { %v1290_v3 = vrot.slane %v1274_v56, 4  ;;  %v1258_v6 = vrot.slane %v1257_v63, 1  ;;  %1462 = vst [vmem:[%s2465_s27] sm:$0x1] %v1391_v16  ;;  %vm1410_vm9 = vcmp.lt.s32.totalorder %v2431_v32, %v1409_v8  ;;  %vm1420_vm10 = vcmp.lt.s32.totalorder %v1418_v54, %v1419_v15 }
 0x15d   : > { %vm1397_vm8 = vcmp.lt.s32.totalorder %v1395_v51, %v1396_v36  ;;  %v1807_v45 = vpop.eup %1806  ;;  %v1411_v27 = vsel %vm1410_vm9, %v2431_v32, %v1409_v8  ;;  %v1421_v28 = vsel %vm1420_vm10, %v1418_v54, %v1419_v15  ;;  %vm1430_vm12 = vcmp.lt.s32.totalorder %v1428_v59, %v1429_v23 }
 0x15e   : > { %v1306_v13 = vadd.f32 %v1290_v3, %v1097_v55  ;;  %v1259_v22 = vadd.f32 %v1258_v6, %v1257_v63  ;;  %v1398_v19 = vsel %vm1397_vm8, %v1395_v51, %v1396_v36  ;;  %vm1440_vm13 = vcmp.lt.s32.totalorder %v1438_v2, %v1439_v12  ;;  %1464 = vst [vmem:[%s2465_s27 + $0x2] sm:$0x1] %v1411_v27 }
 0x15f   : > { %v1399_v21 = vrot.slane %v1398_v19, 1  ;;  %v1431_v34 = vsel %vm1430_vm12, %v1428_v59, %v1429_v23  ;;  %v1441_v39 = vsel %vm1440_vm13, %v1438_v2, %v1439_v12  ;;  %v881_v43 = vmul.f32 %v1807_v45, %v2420_v7  ;;  %1465 = vst [vmem:[%s2465_s27 + $0x3] sm:$0x1] %v1421_v28 }
 0x160   : > { %v1352_v20 = vsel %vm729_vm2, %v1306_v13, -inf  ;;  %1810 = vrcp.f32 %v1259_v22  ;;  %v1809_v17 = vpop.eup %1808  ;;  %1466 = vst [vmem:[%s2465_s27 + $0x4] sm:$0x1] %v1431_v34 }
 0x161   : > { %v1353_v24 = vrot.slane %v1352_v20, 4  ;;  %v1066_v26 = vmul.f32 %v1809_v17, %v2422_v11  ;;  %vm1400_vm11 = vcmp.lt.s32.totalorder %v1398_v19, %v1399_v21  ;;  %1467 = vst [vmem:[%s2465_s27 + $0x5] sm:$0x1] %v1441_v39 }
 0x162   : > { %v1401_v31 = vsel %vm1400_vm11, %v1398_v19, %v1399_v21 }
 0x163   : > { %v1354_v33 = vmax.f32 %v1352_v20, %v1353_v24  ;;  %v1082_v38 = vrot.slane %v1066_v26, 2  ;;  %1463 = vst [vmem:[%s2465_s27 + $0x1] sm:$0x1] %v1401_v31 }
 0x165   : > { %v1355_v40 = vrot.slane %v1354_v33, 2  ;;  %v1098_v46 = vadd.f32 %v1082_v38, %v881_v43 }
 0x166   : > { %v1811_v11 = vpop.eup %1810 }
 0x167   : > { %v1356_v9 = vmax.f32 %v1354_v33, %v1355_v40  ;;  %v1275_v32 = vmul.f32 %v1811_v11, %v2444_v30 }
 0x169   : > { %v1357_v44 = vrot.slane %v1356_v9, 1  ;;  %v1291_v25 = vrot.slane %v1275_v32, 4 }
 0x16b   : > { %v1358_v48 = vmax.f32 %v1356_v9, %v1357_v44  ;;  %v1307_v47 = vadd.f32 %v1291_v25, %v1098_v46 }
 0x16d   : > { %vm1372_vm14 = vcmp.ge.f32.partialorder %v1306_v13, %v1358_v48  ;;  %v1359_v62 = vsel %vm729_vm2, %v1307_v47, -inf }
 0x16e   : > { %v1380_v0 = vsel %vm1372_vm14, %v2317_v5, 2  ;;  %v1360_v49 = vrot.slane %v1359_v62, 4 }
 0x16f   : > { %v1442_v7 = vsel %vm729_vm2, %v1380_v0, 2147483647 }
 0x170   : > { %v1443_v14 = vrot.slane %v1442_v7, 4  ;;  %v1361_v10 = vmax.f32 %v1359_v62, %v1360_v49 }
 0x172   : > { %vm1444_vm15 = vcmp.lt.s32.totalorder %v1442_v7, %v1443_v14  ;;  %v1362_v50 = vrot.slane %v1361_v10, 2 }
 0x173   : > { %v1445_v30 = vsel %vm1444_vm15, %v1442_v7, %v1443_v14 }
 0x174   : > { %v1446_v41 = vrot.slane %v1445_v30, 2  ;;  %v1363_v52 = vmax.f32 %v1361_v10, %v1362_v50 }
 0x176   : > { %vm1447_vm0 = vcmp.lt.s32.totalorder %v1445_v30, %v1446_v41  ;;  %v1364_v4 = vrot.slane %v1363_v52, 1 }
 0x177   : > { %v1448_v37 = vsel %vm1447_vm0, %v1445_v30, %v1446_v41 }
 0x178   : > { %v1449_v29 = vrot.slane %v1448_v37, 1  ;;  %v1365_v53 = vmax.f32 %v1363_v52, %v1364_v4 }
 0x17a   : > { %vm1373_vm1 = vcmp.ge.f32.partialorder %v1307_v47, %v1365_v53  ;;  %vm1450_vm3 = vcmp.lt.s32.totalorder %v1448_v37, %v1449_v29 }
 0x17b   : > { %v1381_v54 = vsel %vm1373_vm1, %v2317_v5, 2  ;;  %v1451_v57 = vsel %vm1450_vm3, %v1448_v37, %v1449_v29 }
 0x17c   : > { %v1452_v58 = vsel %vm729_vm2, %v1381_v54, 2147483647  ;;  %1468 = vst [vmem:[%s2465_s27 + $0x6] sm:$0x1] %v1451_v57 }
 0x17d   : > { %v1453_v35 = vrot.slane %v1452_v58, 4 }
 0x17f   : > { %vm1454_vm4 = vcmp.lt.s32.totalorder %v1452_v58, %v1453_v35 }
 0x180   : > { %v1455_v55 = vsel %vm1454_vm4, %v1452_v58, %v1453_v35 }
 0x181   : > { %v1456_v60 = vrot.slane %v1455_v55, 2 }
 0x183   : > { %vm1457_vm5 = vcmp.lt.s32.totalorder %v1455_v55, %v1456_v60 }
 0x184   : > { %v1458_v61 = vsel %vm1457_vm5, %v1455_v55, %v1456_v60 }
 0x185   : > { %v1459_v5 = vrot.slane %v1458_v61, 1 }
 0x187   : > { %vm1460_vm6 = vcmp.lt.s32.totalorder %v1458_v61, %v1459_v5 }
 0x188   : > { %v1461_v42 = vsel %vm1460_vm6, %v1458_v61, %v1459_v5 }
 0x189   : > { %1469 = vst [vmem:[%s2465_s27 + $0x7] sm:$0x1] %v1461_v42 }
 0x18a   : > { %1899 = shalt.err (!%p1896_p13)
}
 0x18b   : > { %1651 = dma.vmem_to_hbm [thread:$0]  (%p2042_p9), %s1485_s15, 128, %s1487_s16, %s1471_s26  }
 0x18c PF: > { %s1498_s28 = sand.u32 1, %s1938_s18   ;;  %p1661_p0 = pnand %p1598_p12, %p2049_p11 }
 0x18d   : > { %s1499_s24 = scalar_lea.sflag [#allocation4], %s1498_s28 }
 0x18e   : > { %p1662_p1 = pneg %p1661_p0 }
 0x190   : > { %1933 = dma.done.wait (%p1662_p1), %s1499_s24, 128  }
 0x191   : > { %1935 = vsyncadd (%p1662_p1), %s1499_s24, 4294967168  ;;  %s24_s23 = sadd.s32 1, %s1958_s23   ;;  %s2545_s21 = sld [smem:[#allocation11_spill]] }
 0x192   : > { %p21_p2 = scmp.ge.s32.totalorder %s24_s23, 4   ;;  %s2546_s22 = sld [smem:[#allocation12_spill]] }
 0x193   : > { %s2547_s18 = smov %s1942_s19  ;;  %s2548_s19 = smov %s1946_s20 }
 0x194   : > { %s2549_s20 = smov %s2047_s7  ;;  %23 = sbr.rel (!%p21_p2) target bundleno = 8 (0x8), region = 104 }
 0x199   :  { %1505 = vsyncpa [#allocation3], 1 }
 0x19a   :  { %1507 = vsyncpa [#allocation3 + $0x1], 1 }
 0x19b   :  { %1508 = vsyncpa [#allocation6], 1 }
 0x19c   :  { %1510 = vsyncpa [#allocation6 + $0x1], 1 }
 0x19d   :  { %1511 = vsyncpa [#allocation4], 1 }
 0x19e   :  { %1513 = vsyncpa [#allocation4 + $0x1], 1 }

</bundles_post_ra>
